<compile_context>
chip_gen: v5e
topology: v5e:2x2
jax: 0.10.0
libtpu: 0.0.40
codegen_flags: <defaults>
</compile_context>

<pallas_src>
import math
import jax
import jax.numpy as jnp
from jax.experimental import pallas as pl
from jax.experimental.pallas import tpu as pltpu

# ---- model hyper-parameters (small, synthetic) ------------------------------
B = 2            # batch
S = 8            # sequence length
H = 32           # hidden size
NH = 2           # attention heads
HD = H // NH     # head dim
F = 64           # FFN intermediate size
L = 2            # encoder layers
VOCAB = 100      # vocab size
NUM_CLASSES = 2
CPAD = 128       # classifier output padded to a lane-dense 128-wide last dim
LN_EPS = 1e-12
BS = B * S


# ---- shared in-kernel helper -------------------------------------------------
def _layer_norm(x, gamma, beta):
    mu = jnp.mean(x, axis=-1, keepdims=True)
    var = jnp.mean((x - mu) ** 2, axis=-1, keepdims=True)
    return (x - mu) * jax.lax.rsqrt(var + LN_EPS) * gamma + beta


# ---- single fused kernel: embeddings-LN + L encoder layers + pool + classify --
def fused_forward_kernel(emb_ref, mask_ref,
                         emb_g_ref, emb_b_ref,
                         wq_ref, bq_ref, wk_ref, bk_ref, wv_ref, bv_ref,
                         wo_ref, bo_ref, ln1_g_ref, ln1_b_ref,
                         w1_ref, b1_ref, w2_ref, b2_ref,
                         ln2_g_ref, ln2_b_ref,
                         wc_ref, bc_ref,
                         hidden_ref, logits_ref):
    # Load all (tiny) weights once; they stay in vregs/VMEM for the whole pass.
    wq, bq = wq_ref[...], bq_ref[...]          # (L, NH, H, HD), (L, NH, 1, HD)
    wk, bk = wk_ref[...], bk_ref[...]
    wv, bv = wv_ref[...], bv_ref[...]
    wo, bo = wo_ref[...], bo_ref[...]          # (L, NH, HD, H), (L, 1, H)
    ln1_g, ln1_b = ln1_g_ref[...], ln1_b_ref[...]
    ln2_g, ln2_b = ln2_g_ref[...], ln2_b_ref[...]
    w1, b1 = w1_ref[...], b1_ref[...]          # (L, H, F), (L, 1, F)
    w2, b2 = w2_ref[...], b2_ref[...]          # (L, F, H), (L, 1, H)

    # ----- embeddings + LayerNorm, batch flattened to (B*S, H) rows -----
    x = emb_ref[...].astype(jnp.float32).reshape(BS, H)
    x = _layer_norm(x, emb_g_ref[...], emb_b_ref[...])

    mask = mask_ref[...].astype(jnp.float32)[:, None, :]    # (B, 1, S) additive
    scale = 1.0 / math.sqrt(HD)

    # ----- L encoder layers, statically unrolled -----
    for l in range(L):
        attn_out = jnp.zeros((BS, H), jnp.float32)
        for h in range(NH):  # pre-split head weights: no lane slice / .T / concat
            qh = (jnp.dot(x, wq[l, h], preferred_element_type=jnp.float32)
                  + bq[l, h]).reshape(B, S, HD)
            kh = (jnp.dot(x, wk[l, h], preferred_element_type=jnp.float32)
                  + bk[l, h]).reshape(B, S, HD)
            vh = (jnp.dot(x, wv[l, h], preferred_element_type=jnp.float32)
                  + bv[l, h]).reshape(B, S, HD)
            scores = jnp.einsum('bqd,bkd->bqk', qh, kh,
                                preferred_element_type=jnp.float32) * scale + mask
            m = jnp.max(scores, axis=-1, keepdims=True)
            e = jnp.exp(scores - m)
            p = e / jnp.sum(e, axis=-1, keepdims=True)
            ctx = jnp.einsum('bqk,bkd->bqd', p, vh,
                             preferred_element_type=jnp.float32).reshape(BS, HD)
            attn_out = attn_out + jnp.dot(ctx, wo[l, h],
                                          preferred_element_type=jnp.float32)
        attn_out = attn_out + bo[l]
        x1 = _layer_norm(x + attn_out, ln1_g[l], ln1_b[l])

        hmid = jnp.dot(x1, w1[l], preferred_element_type=jnp.float32) + b1[l]
        # TODO(synk): HF DistilBERT uses exact (erf) GELU; tanh approximation used for TPU lowering.
        hmid = jax.nn.gelu(hmid, approximate=True)
        ffn = jnp.dot(hmid, w2[l], preferred_element_type=jnp.float32) + b2[l]
        x = _layer_norm(x1 + ffn, ln2_g[l], ln2_b[l])

    hidden = x.reshape(B, S, H)
    hidden_ref[...] = hidden.astype(hidden_ref.dtype)

    # ----- mean pool over sequence (unmasked, == hidden_state.mean(axis=1)) -----
    pooled = jnp.mean(hidden, axis=1)                        # (B, H)
    # dropout(p=0.5) is identity in eval mode
    logits = jnp.dot(pooled, wc_ref[...],
                     preferred_element_type=jnp.float32) + bc_ref[...]
    logits_ref[...] = logits.astype(logits_ref.dtype)        # (B, CPAD) lane-dense store


PARAM_ORDER = ("emb_ln_g", "emb_ln_b", "wq", "bq", "wk", "bk", "wv", "bv",
               "wo", "bo", "ln1_g", "ln1_b", "w1", "b1", "w2", "b2",
               "ln2_g", "ln2_b", "cls_w", "cls_b")


def pallas_fused_forward(emb, mask_add, params):
    # Single grid step (everything fits VMEM at these sizes).  If B or S grows,
    # add a leading "parallel" grid axis so v7x's second TensorCore is used.
    hidden, logits_padded = pl.pallas_call(
        fused_forward_kernel,
        out_shape=(jax.ShapeDtypeStruct((B, S, H), jnp.float32),
                   jax.ShapeDtypeStruct((B, CPAD), jnp.float32)),
    )(emb, mask_add, *[params[k] for k in PARAM_ORDER])
    return hidden, logits_padded


# ---- deterministic parameter construction ------------------------------------
def init_params(key):
    ks = iter(jax.random.split(key, 32))

    def rnd(shape):
        return jax.random.normal(next(ks), shape, jnp.float32) * 0.02

    cls_w = jnp.zeros((H, CPAD), jnp.float32).at[:, :NUM_CLASSES].set(
        rnd((H, NUM_CLASSES)))
    params = {
        "word_emb": rnd((VOCAB, H)),
        "pos_emb": rnd((S, H)),
        "emb_ln_g": jnp.ones((1, H), jnp.float32),
        "emb_ln_b": jnp.zeros((1, H), jnp.float32),
        # per-layer weights stacked over L; attention projections pre-split per head
        "wq": rnd((L, NH, H, HD)), "bq": jnp.zeros((L, NH, 1, HD), jnp.float32),
        "wk": rnd((L, NH, H, HD)), "bk": jnp.zeros((L, NH, 1, HD), jnp.float32),
        "wv": rnd((L, NH, H, HD)), "bv": jnp.zeros((L, NH, 1, HD), jnp.float32),
        "wo": rnd((L, NH, HD, H)), "bo": jnp.zeros((L, 1, H), jnp.float32),
        "ln1_g": jnp.ones((L, 1, H), jnp.float32),
        "ln1_b": jnp.zeros((L, 1, H), jnp.float32),
        "w1": rnd((L, H, F)), "b1": jnp.zeros((L, 1, F), jnp.float32),
        "w2": rnd((L, F, H)), "b2": jnp.zeros((L, 1, H), jnp.float32),
        "ln2_g": jnp.ones((L, 1, H), jnp.float32),
        "ln2_b": jnp.zeros((L, 1, H), jnp.float32),
        # classifier padded to 128 lanes; real columns are [:NUM_CLASSES]
        "cls_w": cls_w,
        "cls_b": jnp.zeros((1, CPAD), jnp.float32),
    }
    return params


# ---- forward pass mirroring the PyTorch module -------------------------------
@jax.jit
def forward(params, input_ids, attention_mask):
    # embedding gather + pos add is plain-JAX glue feeding the single fused kernel
    pos_ids = jnp.arange(S)[None, :]
    emb = params["word_emb"][input_ids] + params["pos_emb"][pos_ids]   # (B, S, H)

    # additive attention mask (B, S): 0 = attend, -1e9 = pad
    mask_add = (1.0 - attention_mask.astype(jnp.float32)) * -1e9

    hidden, logits_padded = pallas_fused_forward(emb, mask_add, params)
    logits = logits_padded[:, :NUM_CLASSES]
    # TODO(synk): labels / CrossEntropyLoss branch not exercised (labels=None in forward)
    return logits, hidden   # matches (logits,) + (hidden_state,)


if __name__ == "__main__":
    key = jax.random.PRNGKey(0)
    pkey, ikey = jax.random.split(key)
    params = init_params(pkey)

    input_ids = jax.random.randint(ikey, (B, S), 0, VOCAB, dtype=jnp.int32)
    attention_mask = jnp.ones((B, S), jnp.int32).at[1, 6:].set(0)  # pad tail of 2nd example

    logits, hidden = forward(params, input_ids, attention_mask)
    jax.block_until_ready(logits)
    jax.block_until_ready(hidden)

    assert logits.shape == (B, NUM_CLASSES)
    assert hidden.shape == (B, S, H)
    assert bool(jnp.all(jnp.isfinite(logits)))
    assert bool(jnp.all(jnp.isfinite(hidden)))
    print("KERNEL_OK")
</pallas_src>

<mosaic_0001>
module attributes {stable_mosaic.version = 11 : i64} {
  func.func @fused_forward_kernel(%arg0: memref<2x8x32xf32, #tpu.memory_space<vmem>>, %arg1: memref<2x8xf32, #tpu.memory_space<vmem>>, %arg2: memref<1x32xf32, #tpu.memory_space<vmem>>, %arg3: memref<1x32xf32, #tpu.memory_space<vmem>>, %arg4: memref<2x2x32x16xf32, #tpu.memory_space<vmem>>, %arg5: memref<2x2x1x16xf32, #tpu.memory_space<vmem>>, %arg6: memref<2x2x32x16xf32, #tpu.memory_space<vmem>>, %arg7: memref<2x2x1x16xf32, #tpu.memory_space<vmem>>, %arg8: memref<2x2x32x16xf32, #tpu.memory_space<vmem>>, %arg9: memref<2x2x1x16xf32, #tpu.memory_space<vmem>>, %arg10: memref<2x2x16x32xf32, #tpu.memory_space<vmem>>, %arg11: memref<2x1x32xf32, #tpu.memory_space<vmem>>, %arg12: memref<2x1x32xf32, #tpu.memory_space<vmem>>, %arg13: memref<2x1x32xf32, #tpu.memory_space<vmem>>, %arg14: memref<2x32x64xf32, #tpu.memory_space<vmem>>, %arg15: memref<2x1x64xf32, #tpu.memory_space<vmem>>, %arg16: memref<2x64x32xf32, #tpu.memory_space<vmem>>, %arg17: memref<2x1x32xf32, #tpu.memory_space<vmem>>, %arg18: memref<2x1x32xf32, #tpu.memory_space<vmem>>, %arg19: memref<2x1x32xf32, #tpu.memory_space<vmem>>, %arg20: memref<32x128xf32, #tpu.memory_space<vmem>>, %arg21: memref<1x128xf32, #tpu.memory_space<vmem>>, %arg22: memref<2x8x32xf32, #tpu.memory_space<vmem>>, %arg23: memref<2x128xf32, #tpu.memory_space<vmem>>) attributes {dimension_semantics = [], scalar_prefetch = 0 : i64, scratch_operands = 0 : i64, tpu.core_type = #tpu.core_type<tc>} {
    %c0 = arith.constant 0 : index
    %c0_0 = arith.constant 0 : index
    %c0_1 = arith.constant 0 : index
    %c0_2 = arith.constant 0 : index
    %0 = vector.load %arg4[%c0, %c0_0, %c0_1, %c0_2] : memref<2x2x32x16xf32, #tpu.memory_space<vmem>>, vector<2x2x32x16xf32>
    %c0_3 = arith.constant 0 : index
    %c0_4 = arith.constant 0 : index
    %c0_5 = arith.constant 0 : index
    %c0_6 = arith.constant 0 : index
    %1 = vector.load %arg5[%c0_3, %c0_4, %c0_5, %c0_6] : memref<2x2x1x16xf32, #tpu.memory_space<vmem>>, vector<2x2x1x16xf32>
    %c0_7 = arith.constant 0 : index
    %c0_8 = arith.constant 0 : index
    %c0_9 = arith.constant 0 : index
    %c0_10 = arith.constant 0 : index
    %2 = vector.load %arg6[%c0_7, %c0_8, %c0_9, %c0_10] : memref<2x2x32x16xf32, #tpu.memory_space<vmem>>, vector<2x2x32x16xf32>
    %c0_11 = arith.constant 0 : index
    %c0_12 = arith.constant 0 : index
    %c0_13 = arith.constant 0 : index
    %c0_14 = arith.constant 0 : index
    %3 = vector.load %arg7[%c0_11, %c0_12, %c0_13, %c0_14] : memref<2x2x1x16xf32, #tpu.memory_space<vmem>>, vector<2x2x1x16xf32>
    %c0_15 = arith.constant 0 : index
    %c0_16 = arith.constant 0 : index
    %c0_17 = arith.constant 0 : index
    %c0_18 = arith.constant 0 : index
    %4 = vector.load %arg8[%c0_15, %c0_16, %c0_17, %c0_18] : memref<2x2x32x16xf32, #tpu.memory_space<vmem>>, vector<2x2x32x16xf32>
    %c0_19 = arith.constant 0 : index
    %c0_20 = arith.constant 0 : index
    %c0_21 = arith.constant 0 : index
    %c0_22 = arith.constant 0 : index
    %5 = vector.load %arg9[%c0_19, %c0_20, %c0_21, %c0_22] : memref<2x2x1x16xf32, #tpu.memory_space<vmem>>, vector<2x2x1x16xf32>
    %c0_23 = arith.constant 0 : index
    %c0_24 = arith.constant 0 : index
    %c0_25 = arith.constant 0 : index
    %c0_26 = arith.constant 0 : index
    %6 = vector.load %arg10[%c0_23, %c0_24, %c0_25, %c0_26] : memref<2x2x16x32xf32, #tpu.memory_space<vmem>>, vector<2x2x16x32xf32>
    %c0_27 = arith.constant 0 : index
    %c0_28 = arith.constant 0 : index
    %c0_29 = arith.constant 0 : index
    %7 = vector.load %arg11[%c0_27, %c0_28, %c0_29] : memref<2x1x32xf32, #tpu.memory_space<vmem>>, vector<2x1x32xf32>
    %c0_30 = arith.constant 0 : index
    %c0_31 = arith.constant 0 : index
    %c0_32 = arith.constant 0 : index
    %8 = vector.load %arg12[%c0_30, %c0_31, %c0_32] : memref<2x1x32xf32, #tpu.memory_space<vmem>>, vector<2x1x32xf32>
    %c0_33 = arith.constant 0 : index
    %c0_34 = arith.constant 0 : index
    %c0_35 = arith.constant 0 : index
    %9 = vector.load %arg13[%c0_33, %c0_34, %c0_35] : memref<2x1x32xf32, #tpu.memory_space<vmem>>, vector<2x1x32xf32>
    %c0_36 = arith.constant 0 : index
    %c0_37 = arith.constant 0 : index
    %c0_38 = arith.constant 0 : index
    %10 = vector.load %arg18[%c0_36, %c0_37, %c0_38] : memref<2x1x32xf32, #tpu.memory_space<vmem>>, vector<2x1x32xf32>
    %c0_39 = arith.constant 0 : index
    %c0_40 = arith.constant 0 : index
    %c0_41 = arith.constant 0 : index
    %11 = vector.load %arg19[%c0_39, %c0_40, %c0_41] : memref<2x1x32xf32, #tpu.memory_space<vmem>>, vector<2x1x32xf32>
    %c0_42 = arith.constant 0 : index
    %c0_43 = arith.constant 0 : index
    %c0_44 = arith.constant 0 : index
    %12 = vector.load %arg14[%c0_42, %c0_43, %c0_44] : memref<2x32x64xf32, #tpu.memory_space<vmem>>, vector<2x32x64xf32>
    %c0_45 = arith.constant 0 : index
    %c0_46 = arith.constant 0 : index
    %c0_47 = arith.constant 0 : index
    %13 = vector.load %arg15[%c0_45, %c0_46, %c0_47] : memref<2x1x64xf32, #tpu.memory_space<vmem>>, vector<2x1x64xf32>
    %c0_48 = arith.constant 0 : index
    %c0_49 = arith.constant 0 : index
    %c0_50 = arith.constant 0 : index
    %14 = vector.load %arg16[%c0_48, %c0_49, %c0_50] : memref<2x64x32xf32, #tpu.memory_space<vmem>>, vector<2x64x32xf32>
    %c0_51 = arith.constant 0 : index
    %c0_52 = arith.constant 0 : index
    %c0_53 = arith.constant 0 : index
    %15 = vector.load %arg17[%c0_51, %c0_52, %c0_53] : memref<2x1x32xf32, #tpu.memory_space<vmem>>, vector<2x1x32xf32>
    %c0_54 = arith.constant 0 : index
    %c0_55 = arith.constant 0 : index
    %c0_56 = arith.constant 0 : index
    %16 = vector.load %arg0[%c0_54, %c0_55, %c0_56] : memref<2x8x32xf32, #tpu.memory_space<vmem>>, vector<2x8x32xf32>
    %17 = vector.shape_cast %16 : vector<2x8x32xf32> to vector<16x32xf32>
    %c0_57 = arith.constant 0 : index
    %c0_58 = arith.constant 0 : index
    %18 = vector.load %arg2[%c0_57, %c0_58] : memref<1x32xf32, #tpu.memory_space<vmem>>, vector<1x32xf32>
    %c0_59 = arith.constant 0 : index
    %c0_60 = arith.constant 0 : index
    %19 = vector.load %arg3[%c0_59, %c0_60] : memref<1x32xf32, #tpu.memory_space<vmem>>, vector<1x32xf32>
    %cst = arith.constant dense<0.000000e+00> : vector<16xf32>
    %20 = vector.multi_reduction <add>, %17, %cst [1] : vector<16x32xf32> to vector<16xf32>
    %21 = vector.shape_cast %20 : vector<16xf32> to vector<16x1xf32>
    %cst_61 = arith.constant 3.200000e+01 : f32
    %22 = vector.broadcast %cst_61 : f32 to vector<16x1xf32>
    %23 = arith.divf %21, %22 : vector<16x1xf32>
    %24 = vector.broadcast %23 : vector<16x1xf32> to vector<16x32xf32>
    %25 = arith.subf %17, %24 : vector<16x32xf32>
    %26 = arith.mulf %25, %25 : vector<16x32xf32>
    %cst_62 = arith.constant dense<0.000000e+00> : vector<16xf32>
    %27 = vector.multi_reduction <add>, %26, %cst_62 [1] : vector<16x32xf32> to vector<16xf32>
    %28 = vector.shape_cast %27 : vector<16xf32> to vector<16x1xf32>
    %cst_63 = arith.constant 3.200000e+01 : f32
    %29 = vector.broadcast %cst_63 : f32 to vector<16x1xf32>
    %30 = arith.divf %28, %29 : vector<16x1xf32>
    %31 = vector.broadcast %23 : vector<16x1xf32> to vector<16x32xf32>
    %32 = arith.subf %17, %31 : vector<16x32xf32>
    %cst_64 = arith.constant 9.99999996E-13 : f32
    %33 = vector.broadcast %cst_64 : f32 to vector<16x1xf32>
    %34 = arith.addf %30, %33 : vector<16x1xf32>
    %35 = math.rsqrt %34 : vector<16x1xf32>
    %36 = vector.broadcast %35 : vector<16x1xf32> to vector<16x32xf32>
    %37 = arith.mulf %32, %36 : vector<16x32xf32>
    %38 = vector.broadcast %18 : vector<1x32xf32> to vector<16x32xf32>
    %39 = arith.mulf %37, %38 : vector<16x32xf32>
    %40 = vector.broadcast %19 : vector<1x32xf32> to vector<16x32xf32>
    %41 = arith.addf %39, %40 : vector<16x32xf32>
    %c0_65 = arith.constant 0 : index
    %c0_66 = arith.constant 0 : index
    %42 = vector.load %arg1[%c0_65, %c0_66] : memref<2x8xf32, #tpu.memory_space<vmem>>, vector<2x8xf32>
    %43 = vector.shape_cast %42 : vector<2x8xf32> to vector<2x1x8xf32>
    %cst_67 = arith.constant 0.000000e+00 : f32
    %44 = vector.broadcast %cst_67 : f32 to vector<16x32xf32>
    %45 = vector.extract_strided_slice %0 {offsets = [0, 0, 0, 0], sizes = [1, 1, 32, 16], strides = [1, 1, 1, 1]} : vector<2x2x32x16xf32> to vector<1x1x32x16xf32>
    %46 = vector.shape_cast %45 : vector<1x1x32x16xf32> to vector<32x16xf32>
    %cst_68 = arith.constant dense<0.000000e+00> : vector<16x16xf32>
    %47 = tpu.matmul %41, %46, %cst_68 {dimension_numbers = #tpu.dot_dimension_numbers<[1], [0], [0], [1], [0, 0, 1, 1], [], []>} : vector<16x32xf32>, vector<32x16xf32>, vector<16x16xf32> -> vector<16x16xf32>
    %48 = vector.extract_strided_slice %1 {offsets = [0, 0, 0, 0], sizes = [1, 1, 1, 16], strides = [1, 1, 1, 1]} : vector<2x2x1x16xf32> to vector<1x1x1x16xf32>
    %49 = vector.shape_cast %48 : vector<1x1x1x16xf32> to vector<1x16xf32>
    %50 = vector.broadcast %49 : vector<1x16xf32> to vector<16x16xf32>
    %51 = arith.addf %47, %50 : vector<16x16xf32>
    %52 = vector.shape_cast %51 : vector<16x16xf32> to vector<2x8x16xf32>
    %53 = vector.extract_strided_slice %2 {offsets = [0, 0, 0, 0], sizes = [1, 1, 32, 16], strides = [1, 1, 1, 1]} : vector<2x2x32x16xf32> to vector<1x1x32x16xf32>
    %54 = vector.shape_cast %53 : vector<1x1x32x16xf32> to vector<32x16xf32>
    %cst_69 = arith.constant dense<0.000000e+00> : vector<16x16xf32>
    %55 = tpu.matmul %41, %54, %cst_69 {dimension_numbers = #tpu.dot_dimension_numbers<[1], [0], [0], [1], [0, 0, 1, 1], [], []>} : vector<16x32xf32>, vector<32x16xf32>, vector<16x16xf32> -> vector<16x16xf32>
    %56 = vector.extract_strided_slice %3 {offsets = [0, 0, 0, 0], sizes = [1, 1, 1, 16], strides = [1, 1, 1, 1]} : vector<2x2x1x16xf32> to vector<1x1x1x16xf32>
    %57 = vector.shape_cast %56 : vector<1x1x1x16xf32> to vector<1x16xf32>
    %58 = vector.broadcast %57 : vector<1x16xf32> to vector<16x16xf32>
    %59 = arith.addf %55, %58 : vector<16x16xf32>
    %60 = vector.shape_cast %59 : vector<16x16xf32> to vector<2x8x16xf32>
    %61 = vector.extract_strided_slice %4 {offsets = [0, 0, 0, 0], sizes = [1, 1, 32, 16], strides = [1, 1, 1, 1]} : vector<2x2x32x16xf32> to vector<1x1x32x16xf32>
    %62 = vector.shape_cast %61 : vector<1x1x32x16xf32> to vector<32x16xf32>
    %cst_70 = arith.constant dense<0.000000e+00> : vector<16x16xf32>
    %63 = tpu.matmul %41, %62, %cst_70 {dimension_numbers = #tpu.dot_dimension_numbers<[1], [0], [0], [1], [0, 0, 1, 1], [], []>} : vector<16x32xf32>, vector<32x16xf32>, vector<16x16xf32> -> vector<16x16xf32>
    %64 = vector.extract_strided_slice %5 {offsets = [0, 0, 0, 0], sizes = [1, 1, 1, 16], strides = [1, 1, 1, 1]} : vector<2x2x1x16xf32> to vector<1x1x1x16xf32>
    %65 = vector.shape_cast %64 : vector<1x1x1x16xf32> to vector<1x16xf32>
    %66 = vector.broadcast %65 : vector<1x16xf32> to vector<16x16xf32>
    %67 = arith.addf %63, %66 : vector<16x16xf32>
    %68 = vector.shape_cast %67 : vector<16x16xf32> to vector<2x8x16xf32>
    "tpu.trace_start"() <{level = 10 : i32, message = "bqd,bkd->bqk"}> : () -> ()
    %cst_71 = arith.constant dense<0.000000e+00> : vector<2x8x8xf32>
    %69 = tpu.matmul %52, %60, %cst_71 {dimension_numbers = #tpu.dot_dimension_numbers<[2], [2], [1], [1], [0, 0, 0, 1, 1, 1], [0], [0]>} : vector<2x8x16xf32>, vector<2x8x16xf32>, vector<2x8x8xf32> -> vector<2x8x8xf32>
    "tpu.trace_stop"() : () -> ()
    %cst_72 = arith.constant 2.500000e-01 : f32
    %70 = vector.broadcast %cst_72 : f32 to vector<2x8x8xf32>
    %71 = arith.mulf %69, %70 : vector<2x8x8xf32>
    %72 = vector.broadcast %43 : vector<2x1x8xf32> to vector<2x8x8xf32>
    %73 = arith.addf %71, %72 : vector<2x8x8xf32>
    %cst_73 = arith.constant dense<0xFF800000> : vector<2x8xf32>
    %74 = vector.multi_reduction <maximumf>, %73, %cst_73 [2] : vector<2x8x8xf32> to vector<2x8xf32>
    %75 = vector.shape_cast %74 : vector<2x8xf32> to vector<2x8x1xf32>
    %76 = vector.broadcast %75 : vector<2x8x1xf32> to vector<2x8x8xf32>
    %77 = arith.subf %73, %76 : vector<2x8x8xf32>
    %78 = math.exp %77 : vector<2x8x8xf32>
    %cst_74 = arith.constant dense<0.000000e+00> : vector<2x8xf32>
    %79 = vector.multi_reduction <add>, %78, %cst_74 [2] : vector<2x8x8xf32> to vector<2x8xf32>
    %80 = vector.shape_cast %79 : vector<2x8xf32> to vector<2x8x1xf32>
    %81 = vector.broadcast %80 : vector<2x8x1xf32> to vector<2x8x8xf32>
    %82 = arith.divf %78, %81 : vector<2x8x8xf32>
    "tpu.trace_start"() <{level = 10 : i32, message = "bqk,bkd->bqd"}> : () -> ()
    %cst_75 = arith.constant dense<0.000000e+00> : vector<2x8x16xf32>
    %83 = tpu.matmul %82, %68, %cst_75 {dimension_numbers = #tpu.dot_dimension_numbers<[2], [1], [1], [2], [0, 0, 0, 1, 1, 2], [0], [0]>} : vector<2x8x8xf32>, vector<2x8x16xf32>, vector<2x8x16xf32> -> vector<2x8x16xf32>
    "tpu.trace_stop"() : () -> ()
    %84 = vector.shape_cast %83 : vector<2x8x16xf32> to vector<16x16xf32>
    %85 = vector.extract_strided_slice %6 {offsets = [0, 0, 0, 0], sizes = [1, 1, 16, 32], strides = [1, 1, 1, 1]} : vector<2x2x16x32xf32> to vector<1x1x16x32xf32>
    %86 = vector.shape_cast %85 : vector<1x1x16x32xf32> to vector<16x32xf32>
    %cst_76 = arith.constant dense<0.000000e+00> : vector<16x32xf32>
    %87 = tpu.matmul %84, %86, %cst_76 {dimension_numbers = #tpu.dot_dimension_numbers<[1], [0], [0], [1], [0, 0, 1, 1], [], []>} : vector<16x16xf32>, vector<16x32xf32>, vector<16x32xf32> -> vector<16x32xf32>
    %88 = arith.addf %44, %87 : vector<16x32xf32>
    %89 = vector.extract_strided_slice %0 {offsets = [0, 1, 0, 0], sizes = [1, 1, 32, 16], strides = [1, 1, 1, 1]} : vector<2x2x32x16xf32> to vector<1x1x32x16xf32>
    %90 = vector.shape_cast %89 : vector<1x1x32x16xf32> to vector<32x16xf32>
    %cst_77 = arith.constant dense<0.000000e+00> : vector<16x16xf32>
    %91 = tpu.matmul %41, %90, %cst_77 {dimension_numbers = #tpu.dot_dimension_numbers<[1], [0], [0], [1], [0, 0, 1, 1], [], []>} : vector<16x32xf32>, vector<32x16xf32>, vector<16x16xf32> -> vector<16x16xf32>
    %92 = vector.extract_strided_slice %1 {offsets = [0, 1, 0, 0], sizes = [1, 1, 1, 16], strides = [1, 1, 1, 1]} : vector<2x2x1x16xf32> to vector<1x1x1x16xf32>
    %93 = vector.shape_cast %92 : vector<1x1x1x16xf32> to vector<1x16xf32>
    %94 = vector.broadcast %93 : vector<1x16xf32> to vector<16x16xf32>
    %95 = arith.addf %91, %94 : vector<16x16xf32>
    %96 = vector.shape_cast %95 : vector<16x16xf32> to vector<2x8x16xf32>
    %97 = vector.extract_strided_slice %2 {offsets = [0, 1, 0, 0], sizes = [1, 1, 32, 16], strides = [1, 1, 1, 1]} : vector<2x2x32x16xf32> to vector<1x1x32x16xf32>
    %98 = vector.shape_cast %97 : vector<1x1x32x16xf32> to vector<32x16xf32>
    %cst_78 = arith.constant dense<0.000000e+00> : vector<16x16xf32>
    %99 = tpu.matmul %41, %98, %cst_78 {dimension_numbers = #tpu.dot_dimension_numbers<[1], [0], [0], [1], [0, 0, 1, 1], [], []>} : vector<16x32xf32>, vector<32x16xf32>, vector<16x16xf32> -> vector<16x16xf32>
    %100 = vector.extract_strided_slice %3 {offsets = [0, 1, 0, 0], sizes = [1, 1, 1, 16], strides = [1, 1, 1, 1]} : vector<2x2x1x16xf32> to vector<1x1x1x16xf32>
    %101 = vector.shape_cast %100 : vector<1x1x1x16xf32> to vector<1x16xf32>
    %102 = vector.broadcast %101 : vector<1x16xf32> to vector<16x16xf32>
    %103 = arith.addf %99, %102 : vector<16x16xf32>
    %104 = vector.shape_cast %103 : vector<16x16xf32> to vector<2x8x16xf32>
    %105 = vector.extract_strided_slice %4 {offsets = [0, 1, 0, 0], sizes = [1, 1, 32, 16], strides = [1, 1, 1, 1]} : vector<2x2x32x16xf32> to vector<1x1x32x16xf32>
    %106 = vector.shape_cast %105 : vector<1x1x32x16xf32> to vector<32x16xf32>
    %cst_79 = arith.constant dense<0.000000e+00> : vector<16x16xf32>
    %107 = tpu.matmul %41, %106, %cst_79 {dimension_numbers = #tpu.dot_dimension_numbers<[1], [0], [0], [1], [0, 0, 1, 1], [], []>} : vector<16x32xf32>, vector<32x16xf32>, vector<16x16xf32> -> vector<16x16xf32>
    %108 = vector.extract_strided_slice %5 {offsets = [0, 1, 0, 0], sizes = [1, 1, 1, 16], strides = [1, 1, 1, 1]} : vector<2x2x1x16xf32> to vector<1x1x1x16xf32>
    %109 = vector.shape_cast %108 : vector<1x1x1x16xf32> to vector<1x16xf32>
    %110 = vector.broadcast %109 : vector<1x16xf32> to vector<16x16xf32>
    %111 = arith.addf %107, %110 : vector<16x16xf32>
    %112 = vector.shape_cast %111 : vector<16x16xf32> to vector<2x8x16xf32>
    "tpu.trace_start"() <{level = 10 : i32, message = "bqd,bkd->bqk"}> : () -> ()
    %cst_80 = arith.constant dense<0.000000e+00> : vector<2x8x8xf32>
    %113 = tpu.matmul %96, %104, %cst_80 {dimension_numbers = #tpu.dot_dimension_numbers<[2], [2], [1], [1], [0, 0, 0, 1, 1, 1], [0], [0]>} : vector<2x8x16xf32>, vector<2x8x16xf32>, vector<2x8x8xf32> -> vector<2x8x8xf32>
    "tpu.trace_stop"() : () -> ()
    %cst_81 = arith.constant 2.500000e-01 : f32
    %114 = vector.broadcast %cst_81 : f32 to vector<2x8x8xf32>
    %115 = arith.mulf %113, %114 : vector<2x8x8xf32>
    %116 = vector.broadcast %43 : vector<2x1x8xf32> to vector<2x8x8xf32>
    %117 = arith.addf %115, %116 : vector<2x8x8xf32>
    %cst_82 = arith.constant dense<0xFF800000> : vector<2x8xf32>
    %118 = vector.multi_reduction <maximumf>, %117, %cst_82 [2] : vector<2x8x8xf32> to vector<2x8xf32>
    %119 = vector.shape_cast %118 : vector<2x8xf32> to vector<2x8x1xf32>
    %120 = vector.broadcast %119 : vector<2x8x1xf32> to vector<2x8x8xf32>
    %121 = arith.subf %117, %120 : vector<2x8x8xf32>
    %122 = math.exp %121 : vector<2x8x8xf32>
    %cst_83 = arith.constant dense<0.000000e+00> : vector<2x8xf32>
    %123 = vector.multi_reduction <add>, %122, %cst_83 [2] : vector<2x8x8xf32> to vector<2x8xf32>
    %124 = vector.shape_cast %123 : vector<2x8xf32> to vector<2x8x1xf32>
    %125 = vector.broadcast %124 : vector<2x8x1xf32> to vector<2x8x8xf32>
    %126 = arith.divf %122, %125 : vector<2x8x8xf32>
    "tpu.trace_start"() <{level = 10 : i32, message = "bqk,bkd->bqd"}> : () -> ()
    %cst_84 = arith.constant dense<0.000000e+00> : vector<2x8x16xf32>
    %127 = tpu.matmul %126, %112, %cst_84 {dimension_numbers = #tpu.dot_dimension_numbers<[2], [1], [1], [2], [0, 0, 0, 1, 1, 2], [0], [0]>} : vector<2x8x8xf32>, vector<2x8x16xf32>, vector<2x8x16xf32> -> vector<2x8x16xf32>
    "tpu.trace_stop"() : () -> ()
    %128 = vector.shape_cast %127 : vector<2x8x16xf32> to vector<16x16xf32>
    %129 = vector.extract_strided_slice %6 {offsets = [0, 1, 0, 0], sizes = [1, 1, 16, 32], strides = [1, 1, 1, 1]} : vector<2x2x16x32xf32> to vector<1x1x16x32xf32>
    %130 = vector.shape_cast %129 : vector<1x1x16x32xf32> to vector<16x32xf32>
    %cst_85 = arith.constant dense<0.000000e+00> : vector<16x32xf32>
    %131 = tpu.matmul %128, %130, %cst_85 {dimension_numbers = #tpu.dot_dimension_numbers<[1], [0], [0], [1], [0, 0, 1, 1], [], []>} : vector<16x16xf32>, vector<16x32xf32>, vector<16x32xf32> -> vector<16x32xf32>
    %132 = arith.addf %88, %131 : vector<16x32xf32>
    %133 = vector.extract_strided_slice %7 {offsets = [0, 0, 0], sizes = [1, 1, 32], strides = [1, 1, 1]} : vector<2x1x32xf32> to vector<1x1x32xf32>
    %134 = vector.shape_cast %133 : vector<1x1x32xf32> to vector<1x32xf32>
    %135 = vector.broadcast %134 : vector<1x32xf32> to vector<16x32xf32>
    %136 = arith.addf %132, %135 : vector<16x32xf32>
    %137 = arith.addf %41, %136 : vector<16x32xf32>
    %138 = vector.extract_strided_slice %8 {offsets = [0, 0, 0], sizes = [1, 1, 32], strides = [1, 1, 1]} : vector<2x1x32xf32> to vector<1x1x32xf32>
    %139 = vector.shape_cast %138 : vector<1x1x32xf32> to vector<1x32xf32>
    %140 = vector.extract_strided_slice %9 {offsets = [0, 0, 0], sizes = [1, 1, 32], strides = [1, 1, 1]} : vector<2x1x32xf32> to vector<1x1x32xf32>
    %141 = vector.shape_cast %140 : vector<1x1x32xf32> to vector<1x32xf32>
    %cst_86 = arith.constant dense<0.000000e+00> : vector<16xf32>
    %142 = vector.multi_reduction <add>, %137, %cst_86 [1] : vector<16x32xf32> to vector<16xf32>
    %143 = vector.shape_cast %142 : vector<16xf32> to vector<16x1xf32>
    %cst_87 = arith.constant 3.200000e+01 : f32
    %144 = vector.broadcast %cst_87 : f32 to vector<16x1xf32>
    %145 = arith.divf %143, %144 : vector<16x1xf32>
    %146 = vector.broadcast %145 : vector<16x1xf32> to vector<16x32xf32>
    %147 = arith.subf %137, %146 : vector<16x32xf32>
    %148 = arith.mulf %147, %147 : vector<16x32xf32>
    %cst_88 = arith.constant dense<0.000000e+00> : vector<16xf32>
    %149 = vector.multi_reduction <add>, %148, %cst_88 [1] : vector<16x32xf32> to vector<16xf32>
    %150 = vector.shape_cast %149 : vector<16xf32> to vector<16x1xf32>
    %cst_89 = arith.constant 3.200000e+01 : f32
    %151 = vector.broadcast %cst_89 : f32 to vector<16x1xf32>
    %152 = arith.divf %150, %151 : vector<16x1xf32>
    %153 = vector.broadcast %145 : vector<16x1xf32> to vector<16x32xf32>
    %154 = arith.subf %137, %153 : vector<16x32xf32>
    %cst_90 = arith.constant 9.99999996E-13 : f32
    %155 = vector.broadcast %cst_90 : f32 to vector<16x1xf32>
    %156 = arith.addf %152, %155 : vector<16x1xf32>
    %157 = math.rsqrt %156 : vector<16x1xf32>
    %158 = vector.broadcast %157 : vector<16x1xf32> to vector<16x32xf32>
    %159 = arith.mulf %154, %158 : vector<16x32xf32>
    %160 = vector.broadcast %139 : vector<1x32xf32> to vector<16x32xf32>
    %161 = arith.mulf %159, %160 : vector<16x32xf32>
    %162 = vector.broadcast %141 : vector<1x32xf32> to vector<16x32xf32>
    %163 = arith.addf %161, %162 : vector<16x32xf32>
    %164 = vector.extract_strided_slice %12 {offsets = [0, 0, 0], sizes = [1, 32, 64], strides = [1, 1, 1]} : vector<2x32x64xf32> to vector<1x32x64xf32>
    %165 = vector.shape_cast %164 : vector<1x32x64xf32> to vector<32x64xf32>
    %cst_91 = arith.constant dense<0.000000e+00> : vector<16x64xf32>
    %166 = tpu.matmul %163, %165, %cst_91 {dimension_numbers = #tpu.dot_dimension_numbers<[1], [0], [0], [1], [0, 0, 1, 1], [], []>} : vector<16x32xf32>, vector<32x64xf32>, vector<16x64xf32> -> vector<16x64xf32>
    %167 = vector.extract_strided_slice %13 {offsets = [0, 0, 0], sizes = [1, 1, 64], strides = [1, 1, 1]} : vector<2x1x64xf32> to vector<1x1x64xf32>
    %168 = vector.shape_cast %167 : vector<1x1x64xf32> to vector<1x64xf32>
    %169 = vector.broadcast %168 : vector<1x64xf32> to vector<16x64xf32>
    %170 = arith.addf %166, %169 : vector<16x64xf32>
    %171 = arith.mulf %170, %170 : vector<16x64xf32>
    %172 = arith.mulf %170, %171 : vector<16x64xf32>
    %cst_92 = arith.constant 4.471500e-02 : f32
    %173 = vector.broadcast %cst_92 : f32 to vector<16x64xf32>
    %174 = arith.mulf %173, %172 : vector<16x64xf32>
    %175 = arith.addf %170, %174 : vector<16x64xf32>
    %cst_93 = arith.constant 0.797884583 : f32
    %176 = vector.broadcast %cst_93 : f32 to vector<16x64xf32>
    %177 = arith.mulf %176, %175 : vector<16x64xf32>
    %178 = math.tanh %177 : vector<16x64xf32>
    %cst_94 = arith.constant 1.000000e+00 : f32
    %179 = vector.broadcast %cst_94 : f32 to vector<16x64xf32>
    %180 = arith.addf %179, %178 : vector<16x64xf32>
    %cst_95 = arith.constant 5.000000e-01 : f32
    %181 = vector.broadcast %cst_95 : f32 to vector<16x64xf32>
    %182 = arith.mulf %181, %180 : vector<16x64xf32>
    %183 = arith.mulf %170, %182 : vector<16x64xf32>
    %184 = vector.extract_strided_slice %14 {offsets = [0, 0, 0], sizes = [1, 64, 32], strides = [1, 1, 1]} : vector<2x64x32xf32> to vector<1x64x32xf32>
    %185 = vector.shape_cast %184 : vector<1x64x32xf32> to vector<64x32xf32>
    %cst_96 = arith.constant dense<0.000000e+00> : vector<16x32xf32>
    %186 = tpu.matmul %183, %185, %cst_96 {dimension_numbers = #tpu.dot_dimension_numbers<[1], [0], [0], [1], [0, 0, 1, 1], [], []>} : vector<16x64xf32>, vector<64x32xf32>, vector<16x32xf32> -> vector<16x32xf32>
    %187 = vector.extract_strided_slice %15 {offsets = [0, 0, 0], sizes = [1, 1, 32], strides = [1, 1, 1]} : vector<2x1x32xf32> to vector<1x1x32xf32>
    %188 = vector.shape_cast %187 : vector<1x1x32xf32> to vector<1x32xf32>
    %189 = vector.broadcast %188 : vector<1x32xf32> to vector<16x32xf32>
    %190 = arith.addf %186, %189 : vector<16x32xf32>
    %191 = arith.addf %163, %190 : vector<16x32xf32>
    %192 = vector.extract_strided_slice %10 {offsets = [0, 0, 0], sizes = [1, 1, 32], strides = [1, 1, 1]} : vector<2x1x32xf32> to vector<1x1x32xf32>
    %193 = vector.shape_cast %192 : vector<1x1x32xf32> to vector<1x32xf32>
    %194 = vector.extract_strided_slice %11 {offsets = [0, 0, 0], sizes = [1, 1, 32], strides = [1, 1, 1]} : vector<2x1x32xf32> to vector<1x1x32xf32>
    %195 = vector.shape_cast %194 : vector<1x1x32xf32> to vector<1x32xf32>
    %cst_97 = arith.constant dense<0.000000e+00> : vector<16xf32>
    %196 = vector.multi_reduction <add>, %191, %cst_97 [1] : vector<16x32xf32> to vector<16xf32>
    %197 = vector.shape_cast %196 : vector<16xf32> to vector<16x1xf32>
    %cst_98 = arith.constant 3.200000e+01 : f32
    %198 = vector.broadcast %cst_98 : f32 to vector<16x1xf32>
    %199 = arith.divf %197, %198 : vector<16x1xf32>
    %200 = vector.broadcast %199 : vector<16x1xf32> to vector<16x32xf32>
    %201 = arith.subf %191, %200 : vector<16x32xf32>
    %202 = arith.mulf %201, %201 : vector<16x32xf32>
    %cst_99 = arith.constant dense<0.000000e+00> : vector<16xf32>
    %203 = vector.multi_reduction <add>, %202, %cst_99 [1] : vector<16x32xf32> to vector<16xf32>
    %204 = vector.shape_cast %203 : vector<16xf32> to vector<16x1xf32>
    %cst_100 = arith.constant 3.200000e+01 : f32
    %205 = vector.broadcast %cst_100 : f32 to vector<16x1xf32>
    %206 = arith.divf %204, %205 : vector<16x1xf32>
    %207 = vector.broadcast %199 : vector<16x1xf32> to vector<16x32xf32>
    %208 = arith.subf %191, %207 : vector<16x32xf32>
    %cst_101 = arith.constant 9.99999996E-13 : f32
    %209 = vector.broadcast %cst_101 : f32 to vector<16x1xf32>
    %210 = arith.addf %206, %209 : vector<16x1xf32>
    %211 = math.rsqrt %210 : vector<16x1xf32>
    %212 = vector.broadcast %211 : vector<16x1xf32> to vector<16x32xf32>
    %213 = arith.mulf %208, %212 : vector<16x32xf32>
    %214 = vector.broadcast %193 : vector<1x32xf32> to vector<16x32xf32>
    %215 = arith.mulf %213, %214 : vector<16x32xf32>
    %216 = vector.broadcast %195 : vector<1x32xf32> to vector<16x32xf32>
    %217 = arith.addf %215, %216 : vector<16x32xf32>
    %cst_102 = arith.constant 0.000000e+00 : f32
    %218 = vector.broadcast %cst_102 : f32 to vector<16x32xf32>
    %219 = vector.extract_strided_slice %0 {offsets = [1, 0, 0, 0], sizes = [1, 1, 32, 16], strides = [1, 1, 1, 1]} : vector<2x2x32x16xf32> to vector<1x1x32x16xf32>
    %220 = vector.shape_cast %219 : vector<1x1x32x16xf32> to vector<32x16xf32>
    %cst_103 = arith.constant dense<0.000000e+00> : vector<16x16xf32>
    %221 = tpu.matmul %217, %220, %cst_103 {dimension_numbers = #tpu.dot_dimension_numbers<[1], [0], [0], [1], [0, 0, 1, 1], [], []>} : vector<16x32xf32>, vector<32x16xf32>, vector<16x16xf32> -> vector<16x16xf32>
    %222 = vector.extract_strided_slice %1 {offsets = [1, 0, 0, 0], sizes = [1, 1, 1, 16], strides = [1, 1, 1, 1]} : vector<2x2x1x16xf32> to vector<1x1x1x16xf32>
    %223 = vector.shape_cast %222 : vector<1x1x1x16xf32> to vector<1x16xf32>
    %224 = vector.broadcast %223 : vector<1x16xf32> to vector<16x16xf32>
    %225 = arith.addf %221, %224 : vector<16x16xf32>
    %226 = vector.shape_cast %225 : vector<16x16xf32> to vector<2x8x16xf32>
    %227 = vector.extract_strided_slice %2 {offsets = [1, 0, 0, 0], sizes = [1, 1, 32, 16], strides = [1, 1, 1, 1]} : vector<2x2x32x16xf32> to vector<1x1x32x16xf32>
    %228 = vector.shape_cast %227 : vector<1x1x32x16xf32> to vector<32x16xf32>
    %cst_104 = arith.constant dense<0.000000e+00> : vector<16x16xf32>
    %229 = tpu.matmul %217, %228, %cst_104 {dimension_numbers = #tpu.dot_dimension_numbers<[1], [0], [0], [1], [0, 0, 1, 1], [], []>} : vector<16x32xf32>, vector<32x16xf32>, vector<16x16xf32> -> vector<16x16xf32>
    %230 = vector.extract_strided_slice %3 {offsets = [1, 0, 0, 0], sizes = [1, 1, 1, 16], strides = [1, 1, 1, 1]} : vector<2x2x1x16xf32> to vector<1x1x1x16xf32>
    %231 = vector.shape_cast %230 : vector<1x1x1x16xf32> to vector<1x16xf32>
    %232 = vector.broadcast %231 : vector<1x16xf32> to vector<16x16xf32>
    %233 = arith.addf %229, %232 : vector<16x16xf32>
    %234 = vector.shape_cast %233 : vector<16x16xf32> to vector<2x8x16xf32>
    %235 = vector.extract_strided_slice %4 {offsets = [1, 0, 0, 0], sizes = [1, 1, 32, 16], strides = [1, 1, 1, 1]} : vector<2x2x32x16xf32> to vector<1x1x32x16xf32>
    %236 = vector.shape_cast %235 : vector<1x1x32x16xf32> to vector<32x16xf32>
    %cst_105 = arith.constant dense<0.000000e+00> : vector<16x16xf32>
    %237 = tpu.matmul %217, %236, %cst_105 {dimension_numbers = #tpu.dot_dimension_numbers<[1], [0], [0], [1], [0, 0, 1, 1], [], []>} : vector<16x32xf32>, vector<32x16xf32>, vector<16x16xf32> -> vector<16x16xf32>
    %238 = vector.extract_strided_slice %5 {offsets = [1, 0, 0, 0], sizes = [1, 1, 1, 16], strides = [1, 1, 1, 1]} : vector<2x2x1x16xf32> to vector<1x1x1x16xf32>
    %239 = vector.shape_cast %238 : vector<1x1x1x16xf32> to vector<1x16xf32>
    %240 = vector.broadcast %239 : vector<1x16xf32> to vector<16x16xf32>
    %241 = arith.addf %237, %240 : vector<16x16xf32>
    %242 = vector.shape_cast %241 : vector<16x16xf32> to vector<2x8x16xf32>
    "tpu.trace_start"() <{level = 10 : i32, message = "bqd,bkd->bqk"}> : () -> ()
    %cst_106 = arith.constant dense<0.000000e+00> : vector<2x8x8xf32>
    %243 = tpu.matmul %226, %234, %cst_106 {dimension_numbers = #tpu.dot_dimension_numbers<[2], [2], [1], [1], [0, 0, 0, 1, 1, 1], [0], [0]>} : vector<2x8x16xf32>, vector<2x8x16xf32>, vector<2x8x8xf32> -> vector<2x8x8xf32>
    "tpu.trace_stop"() : () -> ()
    %cst_107 = arith.constant 2.500000e-01 : f32
    %244 = vector.broadcast %cst_107 : f32 to vector<2x8x8xf32>
    %245 = arith.mulf %243, %244 : vector<2x8x8xf32>
    %246 = vector.broadcast %43 : vector<2x1x8xf32> to vector<2x8x8xf32>
    %247 = arith.addf %245, %246 : vector<2x8x8xf32>
    %cst_108 = arith.constant dense<0xFF800000> : vector<2x8xf32>
    %248 = vector.multi_reduction <maximumf>, %247, %cst_108 [2] : vector<2x8x8xf32> to vector<2x8xf32>
    %249 = vector.shape_cast %248 : vector<2x8xf32> to vector<2x8x1xf32>
    %250 = vector.broadcast %249 : vector<2x8x1xf32> to vector<2x8x8xf32>
    %251 = arith.subf %247, %250 : vector<2x8x8xf32>
    %252 = math.exp %251 : vector<2x8x8xf32>
    %cst_109 = arith.constant dense<0.000000e+00> : vector<2x8xf32>
    %253 = vector.multi_reduction <add>, %252, %cst_109 [2] : vector<2x8x8xf32> to vector<2x8xf32>
    %254 = vector.shape_cast %253 : vector<2x8xf32> to vector<2x8x1xf32>
    %255 = vector.broadcast %254 : vector<2x8x1xf32> to vector<2x8x8xf32>
    %256 = arith.divf %252, %255 : vector<2x8x8xf32>
    "tpu.trace_start"() <{level = 10 : i32, message = "bqk,bkd->bqd"}> : () -> ()
    %cst_110 = arith.constant dense<0.000000e+00> : vector<2x8x16xf32>
    %257 = tpu.matmul %256, %242, %cst_110 {dimension_numbers = #tpu.dot_dimension_numbers<[2], [1], [1], [2], [0, 0, 0, 1, 1, 2], [0], [0]>} : vector<2x8x8xf32>, vector<2x8x16xf32>, vector<2x8x16xf32> -> vector<2x8x16xf32>
    "tpu.trace_stop"() : () -> ()
    %258 = vector.shape_cast %257 : vector<2x8x16xf32> to vector<16x16xf32>
    %259 = vector.extract_strided_slice %6 {offsets = [1, 0, 0, 0], sizes = [1, 1, 16, 32], strides = [1, 1, 1, 1]} : vector<2x2x16x32xf32> to vector<1x1x16x32xf32>
    %260 = vector.shape_cast %259 : vector<1x1x16x32xf32> to vector<16x32xf32>
    %cst_111 = arith.constant dense<0.000000e+00> : vector<16x32xf32>
    %261 = tpu.matmul %258, %260, %cst_111 {dimension_numbers = #tpu.dot_dimension_numbers<[1], [0], [0], [1], [0, 0, 1, 1], [], []>} : vector<16x16xf32>, vector<16x32xf32>, vector<16x32xf32> -> vector<16x32xf32>
    %262 = arith.addf %218, %261 : vector<16x32xf32>
    %263 = vector.extract_strided_slice %0 {offsets = [1, 1, 0, 0], sizes = [1, 1, 32, 16], strides = [1, 1, 1, 1]} : vector<2x2x32x16xf32> to vector<1x1x32x16xf32>
    %264 = vector.shape_cast %263 : vector<1x1x32x16xf32> to vector<32x16xf32>
    %cst_112 = arith.constant dense<0.000000e+00> : vector<16x16xf32>
    %265 = tpu.matmul %217, %264, %cst_112 {dimension_numbers = #tpu.dot_dimension_numbers<[1], [0], [0], [1], [0, 0, 1, 1], [], []>} : vector<16x32xf32>, vector<32x16xf32>, vector<16x16xf32> -> vector<16x16xf32>
    %266 = vector.extract_strided_slice %1 {offsets = [1, 1, 0, 0], sizes = [1, 1, 1, 16], strides = [1, 1, 1, 1]} : vector<2x2x1x16xf32> to vector<1x1x1x16xf32>
    %267 = vector.shape_cast %266 : vector<1x1x1x16xf32> to vector<1x16xf32>
    %268 = vector.broadcast %267 : vector<1x16xf32> to vector<16x16xf32>
    %269 = arith.addf %265, %268 : vector<16x16xf32>
    %270 = vector.shape_cast %269 : vector<16x16xf32> to vector<2x8x16xf32>
    %271 = vector.extract_strided_slice %2 {offsets = [1, 1, 0, 0], sizes = [1, 1, 32, 16], strides = [1, 1, 1, 1]} : vector<2x2x32x16xf32> to vector<1x1x32x16xf32>
    %272 = vector.shape_cast %271 : vector<1x1x32x16xf32> to vector<32x16xf32>
    %cst_113 = arith.constant dense<0.000000e+00> : vector<16x16xf32>
    %273 = tpu.matmul %217, %272, %cst_113 {dimension_numbers = #tpu.dot_dimension_numbers<[1], [0], [0], [1], [0, 0, 1, 1], [], []>} : vector<16x32xf32>, vector<32x16xf32>, vector<16x16xf32> -> vector<16x16xf32>
    %274 = vector.extract_strided_slice %3 {offsets = [1, 1, 0, 0], sizes = [1, 1, 1, 16], strides = [1, 1, 1, 1]} : vector<2x2x1x16xf32> to vector<1x1x1x16xf32>
    %275 = vector.shape_cast %274 : vector<1x1x1x16xf32> to vector<1x16xf32>
    %276 = vector.broadcast %275 : vector<1x16xf32> to vector<16x16xf32>
    %277 = arith.addf %273, %276 : vector<16x16xf32>
    %278 = vector.shape_cast %277 : vector<16x16xf32> to vector<2x8x16xf32>
    %279 = vector.extract_strided_slice %4 {offsets = [1, 1, 0, 0], sizes = [1, 1, 32, 16], strides = [1, 1, 1, 1]} : vector<2x2x32x16xf32> to vector<1x1x32x16xf32>
    %280 = vector.shape_cast %279 : vector<1x1x32x16xf32> to vector<32x16xf32>
    %cst_114 = arith.constant dense<0.000000e+00> : vector<16x16xf32>
    %281 = tpu.matmul %217, %280, %cst_114 {dimension_numbers = #tpu.dot_dimension_numbers<[1], [0], [0], [1], [0, 0, 1, 1], [], []>} : vector<16x32xf32>, vector<32x16xf32>, vector<16x16xf32> -> vector<16x16xf32>
    %282 = vector.extract_strided_slice %5 {offsets = [1, 1, 0, 0], sizes = [1, 1, 1, 16], strides = [1, 1, 1, 1]} : vector<2x2x1x16xf32> to vector<1x1x1x16xf32>
    %283 = vector.shape_cast %282 : vector<1x1x1x16xf32> to vector<1x16xf32>
    %284 = vector.broadcast %283 : vector<1x16xf32> to vector<16x16xf32>
    %285 = arith.addf %281, %284 : vector<16x16xf32>
    %286 = vector.shape_cast %285 : vector<16x16xf32> to vector<2x8x16xf32>
    "tpu.trace_start"() <{level = 10 : i32, message = "bqd,bkd->bqk"}> : () -> ()
    %cst_115 = arith.constant dense<0.000000e+00> : vector<2x8x8xf32>
    %287 = tpu.matmul %270, %278, %cst_115 {dimension_numbers = #tpu.dot_dimension_numbers<[2], [2], [1], [1], [0, 0, 0, 1, 1, 1], [0], [0]>} : vector<2x8x16xf32>, vector<2x8x16xf32>, vector<2x8x8xf32> -> vector<2x8x8xf32>
    "tpu.trace_stop"() : () -> ()
    %cst_116 = arith.constant 2.500000e-01 : f32
    %288 = vector.broadcast %cst_116 : f32 to vector<2x8x8xf32>
    %289 = arith.mulf %287, %288 : vector<2x8x8xf32>
    %290 = vector.broadcast %43 : vector<2x1x8xf32> to vector<2x8x8xf32>
    %291 = arith.addf %289, %290 : vector<2x8x8xf32>
    %cst_117 = arith.constant dense<0xFF800000> : vector<2x8xf32>
    %292 = vector.multi_reduction <maximumf>, %291, %cst_117 [2] : vector<2x8x8xf32> to vector<2x8xf32>
    %293 = vector.shape_cast %292 : vector<2x8xf32> to vector<2x8x1xf32>
    %294 = vector.broadcast %293 : vector<2x8x1xf32> to vector<2x8x8xf32>
    %295 = arith.subf %291, %294 : vector<2x8x8xf32>
    %296 = math.exp %295 : vector<2x8x8xf32>
    %cst_118 = arith.constant dense<0.000000e+00> : vector<2x8xf32>
    %297 = vector.multi_reduction <add>, %296, %cst_118 [2] : vector<2x8x8xf32> to vector<2x8xf32>
    %298 = vector.shape_cast %297 : vector<2x8xf32> to vector<2x8x1xf32>
    %299 = vector.broadcast %298 : vector<2x8x1xf32> to vector<2x8x8xf32>
    %300 = arith.divf %296, %299 : vector<2x8x8xf32>
    "tpu.trace_start"() <{level = 10 : i32, message = "bqk,bkd->bqd"}> : () -> ()
    %cst_119 = arith.constant dense<0.000000e+00> : vector<2x8x16xf32>
    %301 = tpu.matmul %300, %286, %cst_119 {dimension_numbers = #tpu.dot_dimension_numbers<[2], [1], [1], [2], [0, 0, 0, 1, 1, 2], [0], [0]>} : vector<2x8x8xf32>, vector<2x8x16xf32>, vector<2x8x16xf32> -> vector<2x8x16xf32>
    "tpu.trace_stop"() : () -> ()
    %302 = vector.shape_cast %301 : vector<2x8x16xf32> to vector<16x16xf32>
    %303 = vector.extract_strided_slice %6 {offsets = [1, 1, 0, 0], sizes = [1, 1, 16, 32], strides = [1, 1, 1, 1]} : vector<2x2x16x32xf32> to vector<1x1x16x32xf32>
    %304 = vector.shape_cast %303 : vector<1x1x16x32xf32> to vector<16x32xf32>
    %cst_120 = arith.constant dense<0.000000e+00> : vector<16x32xf32>
    %305 = tpu.matmul %302, %304, %cst_120 {dimension_numbers = #tpu.dot_dimension_numbers<[1], [0], [0], [1], [0, 0, 1, 1], [], []>} : vector<16x16xf32>, vector<16x32xf32>, vector<16x32xf32> -> vector<16x32xf32>
    %306 = arith.addf %262, %305 : vector<16x32xf32>
    %307 = vector.extract_strided_slice %7 {offsets = [1, 0, 0], sizes = [1, 1, 32], strides = [1, 1, 1]} : vector<2x1x32xf32> to vector<1x1x32xf32>
    %308 = vector.shape_cast %307 : vector<1x1x32xf32> to vector<1x32xf32>
    %309 = vector.broadcast %308 : vector<1x32xf32> to vector<16x32xf32>
    %310 = arith.addf %306, %309 : vector<16x32xf32>
    %311 = arith.addf %217, %310 : vector<16x32xf32>
    %312 = vector.extract_strided_slice %8 {offsets = [1, 0, 0], sizes = [1, 1, 32], strides = [1, 1, 1]} : vector<2x1x32xf32> to vector<1x1x32xf32>
    %313 = vector.shape_cast %312 : vector<1x1x32xf32> to vector<1x32xf32>
    %314 = vector.extract_strided_slice %9 {offsets = [1, 0, 0], sizes = [1, 1, 32], strides = [1, 1, 1]} : vector<2x1x32xf32> to vector<1x1x32xf32>
    %315 = vector.shape_cast %314 : vector<1x1x32xf32> to vector<1x32xf32>
    %cst_121 = arith.constant dense<0.000000e+00> : vector<16xf32>
    %316 = vector.multi_reduction <add>, %311, %cst_121 [1] : vector<16x32xf32> to vector<16xf32>
    %317 = vector.shape_cast %316 : vector<16xf32> to vector<16x1xf32>
    %cst_122 = arith.constant 3.200000e+01 : f32
    %318 = vector.broadcast %cst_122 : f32 to vector<16x1xf32>
    %319 = arith.divf %317, %318 : vector<16x1xf32>
    %320 = vector.broadcast %319 : vector<16x1xf32> to vector<16x32xf32>
    %321 = arith.subf %311, %320 : vector<16x32xf32>
    %322 = arith.mulf %321, %321 : vector<16x32xf32>
    %cst_123 = arith.constant dense<0.000000e+00> : vector<16xf32>
    %323 = vector.multi_reduction <add>, %322, %cst_123 [1] : vector<16x32xf32> to vector<16xf32>
    %324 = vector.shape_cast %323 : vector<16xf32> to vector<16x1xf32>
    %cst_124 = arith.constant 3.200000e+01 : f32
    %325 = vector.broadcast %cst_124 : f32 to vector<16x1xf32>
    %326 = arith.divf %324, %325 : vector<16x1xf32>
    %327 = vector.broadcast %319 : vector<16x1xf32> to vector<16x32xf32>
    %328 = arith.subf %311, %327 : vector<16x32xf32>
    %cst_125 = arith.constant 9.99999996E-13 : f32
    %329 = vector.broadcast %cst_125 : f32 to vector<16x1xf32>
    %330 = arith.addf %326, %329 : vector<16x1xf32>
    %331 = math.rsqrt %330 : vector<16x1xf32>
    %332 = vector.broadcast %331 : vector<16x1xf32> to vector<16x32xf32>
    %333 = arith.mulf %328, %332 : vector<16x32xf32>
    %334 = vector.broadcast %313 : vector<1x32xf32> to vector<16x32xf32>
    %335 = arith.mulf %333, %334 : vector<16x32xf32>
    %336 = vector.broadcast %315 : vector<1x32xf32> to vector<16x32xf32>
    %337 = arith.addf %335, %336 : vector<16x32xf32>
    %338 = vector.extract_strided_slice %12 {offsets = [1, 0, 0], sizes = [1, 32, 64], strides = [1, 1, 1]} : vector<2x32x64xf32> to vector<1x32x64xf32>
    %339 = vector.shape_cast %338 : vector<1x32x64xf32> to vector<32x64xf32>
    %cst_126 = arith.constant dense<0.000000e+00> : vector<16x64xf32>
    %340 = tpu.matmul %337, %339, %cst_126 {dimension_numbers = #tpu.dot_dimension_numbers<[1], [0], [0], [1], [0, 0, 1, 1], [], []>} : vector<16x32xf32>, vector<32x64xf32>, vector<16x64xf32> -> vector<16x64xf32>
    %341 = vector.extract_strided_slice %13 {offsets = [1, 0, 0], sizes = [1, 1, 64], strides = [1, 1, 1]} : vector<2x1x64xf32> to vector<1x1x64xf32>
    %342 = vector.shape_cast %341 : vector<1x1x64xf32> to vector<1x64xf32>
    %343 = vector.broadcast %342 : vector<1x64xf32> to vector<16x64xf32>
    %344 = arith.addf %340, %343 : vector<16x64xf32>
    %345 = arith.mulf %344, %344 : vector<16x64xf32>
    %346 = arith.mulf %344, %345 : vector<16x64xf32>
    %cst_127 = arith.constant 4.471500e-02 : f32
    %347 = vector.broadcast %cst_127 : f32 to vector<16x64xf32>
    %348 = arith.mulf %347, %346 : vector<16x64xf32>
    %349 = arith.addf %344, %348 : vector<16x64xf32>
    %cst_128 = arith.constant 0.797884583 : f32
    %350 = vector.broadcast %cst_128 : f32 to vector<16x64xf32>
    %351 = arith.mulf %350, %349 : vector<16x64xf32>
    %352 = math.tanh %351 : vector<16x64xf32>
    %cst_129 = arith.constant 1.000000e+00 : f32
    %353 = vector.broadcast %cst_129 : f32 to vector<16x64xf32>
    %354 = arith.addf %353, %352 : vector<16x64xf32>
    %cst_130 = arith.constant 5.000000e-01 : f32
    %355 = vector.broadcast %cst_130 : f32 to vector<16x64xf32>
    %356 = arith.mulf %355, %354 : vector<16x64xf32>
    %357 = arith.mulf %344, %356 : vector<16x64xf32>
    %358 = vector.extract_strided_slice %14 {offsets = [1, 0, 0], sizes = [1, 64, 32], strides = [1, 1, 1]} : vector<2x64x32xf32> to vector<1x64x32xf32>
    %359 = vector.shape_cast %358 : vector<1x64x32xf32> to vector<64x32xf32>
    %cst_131 = arith.constant dense<0.000000e+00> : vector<16x32xf32>
    %360 = tpu.matmul %357, %359, %cst_131 {dimension_numbers = #tpu.dot_dimension_numbers<[1], [0], [0], [1], [0, 0, 1, 1], [], []>} : vector<16x64xf32>, vector<64x32xf32>, vector<16x32xf32> -> vector<16x32xf32>
    %361 = vector.extract_strided_slice %15 {offsets = [1, 0, 0], sizes = [1, 1, 32], strides = [1, 1, 1]} : vector<2x1x32xf32> to vector<1x1x32xf32>
    %362 = vector.shape_cast %361 : vector<1x1x32xf32> to vector<1x32xf32>
    %363 = vector.broadcast %362 : vector<1x32xf32> to vector<16x32xf32>
    %364 = arith.addf %360, %363 : vector<16x32xf32>
    %365 = arith.addf %337, %364 : vector<16x32xf32>
    %366 = vector.extract_strided_slice %10 {offsets = [1, 0, 0], sizes = [1, 1, 32], strides = [1, 1, 1]} : vector<2x1x32xf32> to vector<1x1x32xf32>
    %367 = vector.shape_cast %366 : vector<1x1x32xf32> to vector<1x32xf32>
    %368 = vector.extract_strided_slice %11 {offsets = [1, 0, 0], sizes = [1, 1, 32], strides = [1, 1, 1]} : vector<2x1x32xf32> to vector<1x1x32xf32>
    %369 = vector.shape_cast %368 : vector<1x1x32xf32> to vector<1x32xf32>
    %cst_132 = arith.constant dense<0.000000e+00> : vector<16xf32>
    %370 = vector.multi_reduction <add>, %365, %cst_132 [1] : vector<16x32xf32> to vector<16xf32>
    %371 = vector.shape_cast %370 : vector<16xf32> to vector<16x1xf32>
    %cst_133 = arith.constant 3.200000e+01 : f32
    %372 = vector.broadcast %cst_133 : f32 to vector<16x1xf32>
    %373 = arith.divf %371, %372 : vector<16x1xf32>
    %374 = vector.broadcast %373 : vector<16x1xf32> to vector<16x32xf32>
    %375 = arith.subf %365, %374 : vector<16x32xf32>
    %376 = arith.mulf %375, %375 : vector<16x32xf32>
    %cst_134 = arith.constant dense<0.000000e+00> : vector<16xf32>
    %377 = vector.multi_reduction <add>, %376, %cst_134 [1] : vector<16x32xf32> to vector<16xf32>
    %378 = vector.shape_cast %377 : vector<16xf32> to vector<16x1xf32>
    %cst_135 = arith.constant 3.200000e+01 : f32
    %379 = vector.broadcast %cst_135 : f32 to vector<16x1xf32>
    %380 = arith.divf %378, %379 : vector<16x1xf32>
    %381 = vector.broadcast %373 : vector<16x1xf32> to vector<16x32xf32>
    %382 = arith.subf %365, %381 : vector<16x32xf32>
    %cst_136 = arith.constant 9.99999996E-13 : f32
    %383 = vector.broadcast %cst_136 : f32 to vector<16x1xf32>
    %384 = arith.addf %380, %383 : vector<16x1xf32>
    %385 = math.rsqrt %384 : vector<16x1xf32>
    %386 = vector.broadcast %385 : vector<16x1xf32> to vector<16x32xf32>
    %387 = arith.mulf %382, %386 : vector<16x32xf32>
    %388 = vector.broadcast %367 : vector<1x32xf32> to vector<16x32xf32>
    %389 = arith.mulf %387, %388 : vector<16x32xf32>
    %390 = vector.broadcast %369 : vector<1x32xf32> to vector<16x32xf32>
    %391 = arith.addf %389, %390 : vector<16x32xf32>
    %392 = vector.shape_cast %391 : vector<16x32xf32> to vector<2x8x32xf32>
    %c0_137 = arith.constant 0 : index
    %c0_138 = arith.constant 0 : index
    %c0_139 = arith.constant 0 : index
    %393 = vector.load %arg22[%c0_137, %c0_138, %c0_139] : memref<2x8x32xf32, #tpu.memory_space<vmem>>, vector<2x8x32xf32>
    tpu.vector_store %arg22[%c0_137, %c0_138, %c0_139], %392 {strides = array<i32>} : memref<2x8x32xf32, #tpu.memory_space<vmem>>, vector<2x8x32xf32>,
    %cst_140 = arith.constant dense<0.000000e+00> : vector<2x32xf32>
    %394 = vector.multi_reduction <add>, %392, %cst_140 [1] : vector<2x8x32xf32> to vector<2x32xf32>
    %cst_141 = arith.constant 8.000000e+00 : f32
    %395 = vector.broadcast %cst_141 : f32 to vector<2x32xf32>
    %396 = arith.divf %394, %395 : vector<2x32xf32>
    %c0_142 = arith.constant 0 : index
    %c0_143 = arith.constant 0 : index
    %397 = vector.load %arg20[%c0_142, %c0_143] : memref<32x128xf32, #tpu.memory_space<vmem>>, vector<32x128xf32>
    %cst_144 = arith.constant dense<0.000000e+00> : vector<2x128xf32>
    %398 = tpu.matmul %396, %397, %cst_144 {dimension_numbers = #tpu.dot_dimension_numbers<[1], [0], [0], [1], [0, 0, 1, 1], [], []>} : vector<2x32xf32>, vector<32x128xf32>, vector<2x128xf32> -> vector<2x128xf32>
    %c0_145 = arith.constant 0 : index
    %c0_146 = arith.constant 0 : index
    %399 = vector.load %arg21[%c0_145, %c0_146] : memref<1x128xf32, #tpu.memory_space<vmem>>, vector<1x128xf32>
    %400 = vector.broadcast %399 : vector<1x128xf32> to vector<2x128xf32>
    %401 = arith.addf %398, %400 : vector<2x128xf32>
    %c0_147 = arith.constant 0 : index
    %c0_148 = arith.constant 0 : index
    %402 = vector.load %arg23[%c0_147, %c0_148] : memref<2x128xf32, #tpu.memory_space<vmem>>, vector<2x128xf32>
    tpu.vector_store %arg23[%c0_147, %c0_148], %401 {strides = array<i32>} : memref<2x128xf32, #tpu.memory_space<vmem>>, vector<2x128xf32>,
    return
  }
}

</mosaic_0001>

<bundles_post_ra>
// kernel: forward.1
= control target key start
LH: loop header
LB: loop body
LE: loop exit
PB: predicated region body
PF: predicated region fallthrough
CT: control target
= control target key end

     0   :  { %s2683_s0 = inlined_call_operand.vmem [shape: f32[2,8,32], index: 0, kind: input, shape index: {}]   ;;  %s2684_s1 = inlined_call_operand.vmem [shape: f32[2,8], index: 1, kind: input, shape index: {}]   ;;  %s2685_s2 = inlined_call_operand.vmem [shape: f32[1,32], index: 2, kind: input, shape index: {}]   ;;  %s2686_s3 = inlined_call_operand.vmem [shape: f32[1,32], index: 3, kind: input, shape index: {}]   ;;  %s2687_s4 = inlined_call_operand.vmem [shape: f32[2,2,32,16], index: 4, kind: input, shape index: {}]   ;;  %s2688_s5 = inlined_call_operand.vmem [shape: f32[2,2,1,16], index: 5, kind: input, shape index: {}]   ;;  %s2689_s6 = inlined_call_operand.vmem [shape: f32[2,2,32,16], index: 6, kind: input, shape index: {}]   ;;  %s2690_s7 = inlined_call_operand.vmem [shape: f32[2,2,1,16], index: 7, kind: input, shape index: {}]   ;;  %s2691_s8 = inlined_call_operand.vmem [shape: f32[2,2,32,16], index: 8, kind: input, shape index: {}]   ;;  %s2692_s9 = inlined_call_operand.vmem [shape: f32[2,2,1,16], index: 9, kind: input, shape index: {}]   ;;  %s2693_s10 = inlined_call_operand.vmem [shape: f32[2,2,16,32], index: 10, kind: input, shape index: {}]   ;;  %s2694_s11 = inlined_call_operand.vmem [shape: f32[2,1,32], index: 11, kind: input, shape index: {}]   ;;  %s2695_s12 = inlined_call_operand.vmem [shape: f32[2,1,32], index: 12, kind: input, shape index: {}]   ;;  %s2696_s13 = inlined_call_operand.vmem [shape: f32[2,1,32], index: 13, kind: input, shape index: {}]   ;;  %s2697_s14 = inlined_call_operand.vmem [shape: f32[2,32,64], index: 14, kind: input, shape index: {}]   ;;  %s2698_s15 = inlined_call_operand.vmem [shape: f32[2,1,64], index: 15, kind: input, shape index: {}]   ;;  %s2699_s16 = inlined_call_operand.vmem [shape: f32[2,64,32], index: 16, kind: input, shape index: {}]   ;;  %s2700_s17 = inlined_call_operand.vmem [shape: f32[2,1,32], index: 17, kind: input, shape index: {}]   ;;  %s2701_s18 = inlined_call_operand.vmem [shape: f32[2,1,32], index: 18, kind: input, shape index: {}]   ;;  %s2702_s19 = inlined_call_operand.vmem [shape: f32[2,1,32], index: 19, kind: input, shape index: {}]   ;;  %s2703_s20 = inlined_call_operand.vmem [shape: f32[32,128], index: 20, kind: input, shape index: {}]   ;;  %s2704_s21 = inlined_call_operand.vmem [shape: f32[1,128], index: 21, kind: input, shape index: {}]   ;;  %s2705_s22 = inlined_call_operand.hbm [shape: f32[2,8,32], index: 22, kind: output, shape index: {0}]   ;;  %s2706_s23 = inlined_call_operand.hbm [shape: f32[2,128], index: 23, kind: output, shape index: {1}]  }
   0x1   :  { %2712 = sst [smem:[#allocation8_spill]] %s2683_s0 }
   0x2   :  { %2713 = sst [smem:[#allocation9_spill]] %s2684_s1 }
   0x3   :  { %2714 = sst [smem:[#allocation10_spill]] %s2685_s2 }
   0x4   :  { %2715 = sst [smem:[#allocation11_spill]] %s2686_s3 }
   0x5   :  { %2716 = sst [smem:[#allocation12_spill]] %s2687_s4 }
   0x6   :  { %2717 = sst [smem:[#allocation13_spill]] %s2688_s5 }
   0x7   :  { %2718 = sst [smem:[#allocation14_spill]] %s2689_s6 }
   0x8   :  { %2719 = sst [smem:[#allocation15_spill]] %s2690_s7 }
   0x9   :  { %29 = vsyncpa [#allocation3], 0  ;;  %s2720_s24 = sld [smem:[#allocation8_spill]]  ;;  %vm185_vm0 = vcmask 261120  }
   0xf   :  { %v181_v0 = vld [vmem:[%s2720_s24] sm:$0xff]  ;;  %v182_v1 = vld [vmem:[%s2720_s24 + $0x8] sm:$0xff] }
  0x10   :  { %v186_v2 = vsel %vm185_vm0, %v181_v0, 0.0  ;;  %v189_v3 = vsel %vm185_vm0, %v182_v1, 0.0 }
  0x11   :  { %187 = vadd.xlane.f32.xlu0 %v186_v2 }
  0x19   :  { %190 = vadd.xlane.f32.xlu0 %v189_v3 }
  0x1a   :  { %30 = vsyncpa [#allocation5], 0  ;;  %v2005_v4 = vmov 32.0   ;;  %s2721_s2 = sld [smem:[#allocation12_spill]]  ;;  %v118_v23 = vld [vmem:[%s2691_s8 + $0x18] sm:$0xff]  ;;  %v117_v26 = vld [vmem:[%s2691_s8 + $0x10] sm:$0xff] }
  0x1b   :  { %1889 = vrcp.f32 %v2005_v4  ;;  %s2722_s7 = sld [smem:[#allocation14_spill]]  ;;  %323 = vmatpush.msra.mxu2 %v118_v23  ;;  %v116_v29 = vld [vmem:[%s2691_s8 + $0x8] sm:$0xff]  ;;  %v115_v32 = vld [vmem:[%s2691_s8] sm:$0xff]  ;;  %vm334_vm8 = vcmask 130048   ;;  %vm395_vm9 = vcmask 64512   ;;  %s1761_s29 = sshll.u32 %s2705_s22, 4  ;;  %s1762_s29 = int_to_ptr.hbm [resolvable:$true] %s1761_s29 }
  0x1c   :  { %s2723_s4 = sld [smem:[#allocation10_spill]]  ;;  %s2008_s3 = smov 128  }
  0x1d   :  { %324 = vmatpush.msra.mxu2 %v117_v26  ;;  %s2724_s25 = sld [smem:[#allocation11_spill]]  ;;  %s1775_s24 = sshll.u32 %s2706_s23, 4  ;;  %s1776_s24 = int_to_ptr.hbm [resolvable:$true] %s1775_s24 }
  0x1e   :  { %s2725_s26 = sld [smem:[#allocation15_spill]] }
  0x1f   :  { %325 = vmatpush.msra.mxu2 %v116_v29  ;;  %s2726_s28 = sld [smem:[#allocation13_spill]] }
  0x20   :  { %v78_v21 = vld [vmem:[%s2721_s2 + $0x18] sm:$0xff]  ;;  %v77_v24 = vld [vmem:[%s2721_s2 + $0x10] sm:$0xff]  ;;  %v76_v27 = vld [vmem:[%s2721_s2 + $0x8] sm:$0xff] }
  0x21   :  { %v1890_v5 = vpop.eup %1889  ;;  %v98_v22 = vld [vmem:[%s2722_s7 + $0x18] sm:$0xff]  ;;  %271 = vmatpush.msra.mxu0 %v78_v21  ;;  %v97_v25 = vld [vmem:[%s2722_s7 + $0x10] sm:$0xff]  ;;  %v96_v28 = vld [vmem:[%s2722_s7 + $0x8] sm:$0xff]  ;;  %326 = vmatpush.msra.mxu2 %v115_v32 }
  0x22   :  { %v193_v6 = vmul.f32 32.0, %v1890_v5  ;;  %vm197_vm1 = vweird.f32 %v1890_v5  ;;  %297 = vmatpush.msra.mxu1 %v98_v22  ;;  %v75_v30 = vld [vmem:[%s2721_s2] sm:$0xff]  ;;  %v102_v36 = vld [vmem:[%s2722_s7 + $0x38] sm:$0xff]  ;;  %v101_v37 = vld [vmem:[%s2722_s7 + $0x30] sm:$0xff] }
  0x23   :  { %272 = vmatpush.msra.mxu0 %v77_v24  ;;  %v95_v31 = vld [vmem:[%s2722_s7] sm:$0xff]  ;;  %531 = vmatpush.msrb.mxu2 %v102_v36  ;;  %v100_v39 = vld [vmem:[%s2722_s7 + $0x28] sm:$0xff] }
  0x24   :  { %v194_v7 = vsub.f32 1.0, %v193_v6  ;;  %298 = vmatpush.msra.mxu1 %v97_v25  ;;  %v99_v41 = vld [vmem:[%s2722_s7 + $0x20] sm:$0xff]  ;;  %v82_v6 = vld [vmem:[%s2721_s2 + $0x38] sm:$0xff] }
  0x25   :  { %273 = vmatpush.msra.mxu0 %v76_v27  ;;  %532 = vmatpush.msrb.mxu2 %v101_v37  ;;  %v1860_v51 = vld [vmem:[%s2723_s4] ss:$0 sm:$0xff]  ;;  %v2261_v21 = vld [vmem:[%s2725_s26 + $0x1] ss:$0 sm:$0xff]  ;;  %s2727_s4 = sld [smem:[#allocation9_spill]] }
  0x26   :  { %v195_v8 = vmul.f32 %v1890_v5, %v194_v7  ;;  %299 = vmatpush.msra.mxu1 %v96_v28  ;;  %v1861_v54 = vld [vmem:[%s2724_s25] ss:$0 sm:$0xff] }
  0x27   :  { %274 = vmatpush.msra.mxu0 %v75_v30  ;;  %533 = vmatpush.msrb.mxu2 %v100_v39  ;;  %v1862_v2 = vld [vmem:[%s2726_s28] ss:$0 sm:$0xff] }
  0x28   :  { %v196_v9 = vadd.f32 %v1890_v5, %v195_v8  ;;  %300 = vmatpush.msra.mxu1 %v95_v31  ;;  %v81_v8 = vld [vmem:[%s2721_s2 + $0x30] sm:$0xff] }
  0x29   :  { %534 = vmatpush.msrb.mxu2 %v99_v41 }
  0x2a   :  { %v2139_v10 = vsel %vm197_vm1, %v1890_v5, %v196_v9  ;;  %v1864_v9 = vld [vmem:[%s2692_s9] ss:$0 sm:$0xff] }
  0x2b   :  { %v247_v24 = vld [vmem:[%s2727_s4] sm:$0x3]  ;;  %s2010_s4 = smov [#allocation4]  }
  0x2c   :  { %v2270_v25 = vperm.slane %v247_v24, 0  ;;  %v249_v30 = vrot.slane %v247_v24, 1  ;;  %s1773_s30 = sshll.u32 %s2010_s4, 4  ;;  %s1774_s30 = int_to_ptr.vmem [resolvable:$true] %s1773_s30 }
  0x2e   :  { %v2274_v31 = vperm.slane %v249_v30, 0 }
  0x84   :  { %v188_v11 = vpop.xlane.xlu0 %187 }
  0x85   :  { %v199_v12 = vmul.f32 %v2139_v10, %v188_v11  ;;  %v80_v11 = vld [vmem:[%s2721_s2 + $0x28] sm:$0xff] }
  0x87   :  { %v2142_v13 = vsub.f32 %v181_v0, %v199_v12 }
  0x89   :  { %v203_v14 = vmul.f32 %v2142_v13, %v2142_v13 }
  0x8b   :  { %v205_v15 = vsel %vm185_vm0, %v203_v14, 0.0  ;;  %v79_v14 = vld [vmem:[%s2721_s2 + $0x20] sm:$0xff] }
  0x8c   :  { %206 = vadd.xlane.f32.xlu1 %v205_v15  ;;  %v191_v16 = vpop.xlane.xlu0 %190 }
  0x8d   :  { %v200_v17 = vmul.f32 %v2139_v10, %v191_v16 }
  0x8f   :  { %v2148_v18 = vsub.f32 %v182_v1, %v200_v17  ;;  %v1863_v1 = vld [vmem:[%s2725_s26] ss:$0 sm:$0xff] }
  0x91   :  { %v204_v19 = vmul.f32 %v2148_v18, %v2148_v18 }
  0x93   :  { %v208_v20 = vsel %vm185_vm0, %v204_v19, 0.0 }
  0x94   :  { %209 = vadd.xlane.f32.xlu1 %v208_v20 }
  0xff   :  { %v207_v33 = vpop.xlane.xlu1 %206 }
 0x100   :  { %v211_v34 = vmul.f32 %v207_v33, %v2139_v10 }
 0x102   :  { %v213_v35 = vadd.f32 1e-12, %v211_v34 }
 0x104   :  { %1891 = vrsqrt.f32 %v213_v35  ;;  %vm221_vm3 = vweird.f32 %v213_v35 }
 0x107   :  { %v210_v38 = vpop.xlane.xlu1 %209 }
 0x108   :  { %v212_v40 = vmul.f32 %v210_v38, %v2139_v10 }
 0x10a   :  { %v1892_v42 = vpop.eup %1891  ;;  %v214_v43 = vadd.f32 1e-12, %v212_v40 }
 0x10b   :  { %v216_v44 = vmul.f32 %v1892_v42, %v213_v35  ;;  %vm222_vm2 = vweird.f32 %v1892_v42 }
 0x10c   :  { %1893 = vrsqrt.f32 %v214_v43  ;;  %vm223_vm4 = vmor %vm221_vm3, %vm222_vm2  ;;  %vm231_vm6 = vweird.f32 %v214_v43 }
 0x10d   :  { %v217_v45 = vmul.f32 %v1892_v42, %v216_v44 }
 0x10f   :  { %v218_v46 = vmul.f32 0.5, %v217_v45 }
 0x111   :  { %v219_v47 = vsub.f32 1.5, %v218_v46  ;;  %v122_v46 = vld [vmem:[%s2691_s8 + $0x38] sm:$0xff] }
 0x112   :  { %v1894_v48 = vpop.eup %1893 }
 0x113   :  { %v220_v49 = vmul.f32 %v1892_v42, %v219_v47  ;;  %v226_v50 = vmul.f32 %v1894_v48, %v214_v43  ;;  %vm232_vm5 = vweird.f32 %v1894_v48  ;;  %v121_v47 = vld [vmem:[%s2691_s8 + $0x30] sm:$0xff] }
 0x114   :  { %vm233_vm7 = vmor %vm231_vm6, %vm232_vm5 }
 0x115   :  { %v224_v52 = vsel %vm223_vm4, %v1892_v42, %v220_v49  ;;  %v227_v53 = vmul.f32 %v1894_v48, %v226_v50  ;;  %v119_v49 = vld [vmem:[%s2691_s8 + $0x20] sm:$0xff] }
 0x116   :  { %v235_v55 = vmul.f32 %v224_v52, %v2142_v13 }
 0x117   :  { %v228_v56 = vmul.f32 0.5, %v227_v53 }
 0x118   :  { %v240_v57 = vmul.f32 %v1860_v51, %v235_v55 }
 0x119   :  { %v229_v58 = vsub.f32 1.5, %v228_v56 }
 0x11a   :  { %v2210_v59 = vadd.f32 %v1861_v54, %v240_v57 }
 0x11b   :  { %v230_v60 = vmul.f32 %v1894_v48, %v229_v58 }
 0x11c   :  { %1789 = vmatmul.msk.f32.vlgmr.msra.gmra.mxu0 %vm185_vm0, %v2210_v59  ;;  %1791 = vmatmul.msk.f32.vlgmr.msra.gmra.mxu1 %vm185_vm0, %v2210_v59 }
 0x11d   :  { %v234_v61 = vsel %vm233_vm7, %v1894_v48, %v230_v60  ;;  %1793 = vmatmul.msk.f32.vlgmr.msra.gmra.mxu2 %vm185_vm0, %v2210_v59  ;;  %v120_v48 = vld [vmem:[%s2691_s8 + $0x28] sm:$0xff] }
 0x11e   :  { %v236_v62 = vmul.f32 %v234_v61, %v2148_v18 }
 0x120   :  { %v241_v63 = vmul.f32 %v1860_v51, %v236_v62 }
 0x122   :  { %v2219_v0 = vadd.f32 %v1861_v54, %v241_v63 }
 0x124   :  { %1790 = vmatmul.msk.f32.gmra.mxu0 %vm185_vm0, %v2219_v0  ;;  %1792 = vmatmul.msk.f32.gmra.mxu1 %vm185_vm0, %v2219_v0 }
 0x125   :  { %1794 = vmatmul.msk.f32.gmra.mxu2 %vm185_vm0, %v2219_v0 }
 0x12d   :  { %1803 = vmatmul.msk.f32.vlgmr.msrb.gmra.mxu2 %vm185_vm0, %v2210_v59 }
 0x135   :  { %1804 = vmatmul.msk.f32.gmra.mxu2 %vm185_vm0, %v2219_v0 }
 0x199   :  { %v276_v3 = vpop.f32.mrf.mxu0  ;;  %v302_v4 = vpop.f32.mrf.mxu1 }
 0x19a   :  { %v303_v5 = vadd.f32 %v1863_v1, %v302_v4  ;;  %v277_v7 = vadd.f32 %v1862_v2, %v276_v3 }
 0x19c   :  { %1795 = vmatpush.xpose.msk.msrb.mxu1 %vm334_vm8, %v303_v5 }
 0x19f   :  { %1796 = vmatmul.msk.f32.vlgmr.msrb.gmra.mxu1 %vm334_vm8, %v277_v7 }
 0x1a0   :  { %505 = vmatpush.msra.mxu1 %v82_v6  ;;  %v328_v12 = vpop.f32.mrf.mxu2 }
 0x1a1   :  { %v305_v13 = vpop.f32.mrf.mxu1  ;;  %v279_v15 = vpop.f32.mrf.mxu0  ;;  %v329_v17 = vadd.f32 %v1864_v9, %v328_v12 }
 0x1a2   :  { %506 = vmatpush.msra.mxu1 %v81_v8  ;;  %v306_v16 = vadd.f32 %v1863_v1, %v305_v13  ;;  %v280_v18 = vadd.f32 %v1862_v2, %v279_v15 }
 0x1a4   :  { %507 = vmatpush.msra.mxu1 %v80_v11  ;;  %1797 = vmatpush.xpose.msk.msra.mxu3 %vm334_vm8, %v306_v16  ;;  %v1866_v16 = vld [vmem:[%s2726_s28 + $0x1] ss:$0 sm:$0xff] }
 0x1a6   :  { %508 = vmatpush.msra.mxu1 %v79_v14 }
 0x1a7   :  { %1798 = vmatmul.msk.f32.vlgmr.msra.gmra.mxu3 %vm334_vm8, %v280_v18  ;;  %1801 = vmatmul.msk.f32.vlgmr.msra.gmra.mxu1 %vm185_vm0, %v2210_v59  ;;  %v136_v18 = vld [vmem:[%s2693_s10 + $0x8] sm:$0xff] }
 0x1a8   :  { %462 = vmatpush.msrb.mxu3 %v329_v17  ;;  %v331_v19 = vpop.f32.mrf.mxu2 }
 0x1a9   :  { %v332_v20 = vadd.f32 %v1864_v9, %v331_v19 }
 0x1aa   :  { %557 = vmatpush.msra.mxu3 %v122_v46 }
 0x1ab   :  { %485 = vmatpush.msrb.mxu0 %v332_v20 }
 0x1ac   :  { %558 = vmatpush.msra.mxu3 %v121_v47 }
 0x1ae   :  { %559 = vmatpush.msra.mxu3 %v120_v48 }
 0x1af   :  { %1802 = vmatmul.msk.f32.gmra.mxu1 %vm185_vm0, %v2219_v0 }
 0x1b0   :  { %v536_v22 = vpop.f32.mrf.mxu2  ;;  %560 = vmatpush.msra.mxu3 %v119_v49  ;;  %v138_v49 = vld [vmem:[%s2693_s10 + $0x18] sm:$0xff] }
 0x1b1   :  { %v537_v23 = vadd.f32 %v2261_v21, %v536_v22 }
 0x1b3   :  { %1807 = vmatpush.xpose.msk.msra.mxu0 %vm334_vm8, %v537_v23  ;;  %v1867_v23 = vld [vmem:[%s2692_s9 + $0x1] ss:$0 sm:$0xff] }
 0x1b8   :  { %v539_v9 = vpop.f32.mrf.mxu2 }
 0x1b9   :  { %v540_v14 = vadd.f32 %v2261_v21, %v539_v9  ;;  %v135_v21 = vld [vmem:[%s2693_s10] sm:$0xff] }
 0x21c   :  { %v358_v26 = vpop.f32.mrf.mxu1 }
 0x21d   :  { %v387_v27 = vmul.f32 0.25, %v358_v26 }
 0x21f   :  { %v393_v28 = vadd.f32 %v2270_v25, %v387_v27 }
 0x221   :  { %v396_v29 = vsel %vm395_vm9, %v393_v28, -inf }
 0x222   :  { %397 = vmax.xlane.f32.xlu0 %v396_v29 }
 0x224   :  { %v510_v15 = vpop.f32.mrf.mxu1 }
 0x225   :  { %v511_v17 = vadd.f32 %v1866_v16, %v510_v15 }
 0x22a   :  { %v384_v32 = vpop.f32.mrf.mxu3 }
 0x22b   :  { %v388_v33 = vmul.f32 0.25, %v384_v32 }
 0x22c   :  { %v513_v19 = vpop.f32.mrf.mxu1 }
 0x22d   :  { %v394_v34 = vadd.f32 %v2274_v31, %v388_v33  ;;  %v514_v20 = vadd.f32 %v1866_v16, %v513_v19  ;;  %v1868_v16 = vld [vmem:[%s2694_s11] ss:$0 sm:$0xff] }
 0x22f   :  { %v399_v35 = vsel %vm395_vm9, %v394_v34, -inf }
 0x230   :  { %400 = vmax.xlane.f32.xlu2 %v399_v35 }
 0x295   :  { %v398_v36 = vpop.xlane.xlu0 %397 }
 0x296   :  { %v402_v37 = vsub.f32 %v393_v28, %v398_v36 }
 0x298   :  { %v404_v38 = vmul.f32 1.442695, %v402_v37 }
 0x29a   :  { %1895 = vpow2.f32 %v404_v38 }
 0x2a0   :  { %v1896_v39 = vpop.eup %1895 }
 0x2a1   :  { %v408_v40 = vsel %vm395_vm9, %v1896_v39, 0.0 }
 0x2a2   :  { %409 = vadd.xlane.f32.xlu1 %v408_v40 }
 0x2a3   :  { %v401_v41 = vpop.xlane.xlu2 %400 }
 0x2a4   :  { %v403_v42 = vsub.f32 %v394_v34, %v401_v41 }
 0x2a6   :  { %v406_v43 = vmul.f32 1.442695, %v403_v42 }
 0x2a8   :  { %1897 = vpow2.f32 %v406_v43 }
 0x2ae   :  { %v1898_v44 = vpop.eup %1897 }
 0x2af   :  { %v411_v45 = vsel %vm395_vm9, %v1898_v44, 0.0 }
 0x2b0   :  { %412 = vadd.xlane.f32.xlu2 %v411_v45 }
 0x315   :  { %v410_v50 = vpop.xlane.xlu1 %409 }
 0x316   :  { %1899 = vrcp.f32 %v410_v50  ;;  %v425_v54 = vand.u32 2147483648, %v410_v50  ;;  %v423_v56 = vand.u32 2147483647, %v410_v50  ;;  %vm419_vm11 = vweird.f32 %v410_v50 }
 0x318   :  { %v426_v60 = vor.u32 1.1754944e-38, %v425_v54  ;;  %vm424_vm13 = vcmp.eq.f32.partialorder %v423_v56, 8.507059e+37 }
 0x31c   :  { %v1900_v51 = vpop.eup %1899 }
 0x31d   :  { %v415_v52 = vmul.f32 %v1900_v51, %v410_v50  ;;  %vm420_vm10 = vweird.f32 %v1900_v51 }
 0x31e   :  { %vm421_vm12 = vmor %vm419_vm11, %vm420_vm10 }
 0x31f   :  { %v416_v53 = vsub.f32 1.0, %v415_v52 }
 0x321   :  { %v417_v55 = vmul.f32 %v1900_v51, %v416_v53 }
 0x323   :  { %v418_v57 = vadd.f32 %v1900_v51, %v417_v55  ;;  %v413_v58 = vpop.xlane.xlu2 %412 }
 0x324   :  { %1901 = vrcp.f32 %v413_v58  ;;  %v440_v4 = vand.u32 2147483648, %v413_v58  ;;  %v438_v6 = vand.u32 2147483647, %v413_v58  ;;  %vm434_vm15 = vweird.f32 %v413_v58 }
 0x325   :  { %v422_v61 = vsel %vm421_vm12, %v1900_v51, %v418_v57 }
 0x326   :  { %v427_v62 = vsel %vm424_vm13, %v426_v60, %v422_v61  ;;  %v441_v8 = vor.u32 1.1754944e-38, %v440_v4  ;;  %vm439_vm2 = vcmp.eq.f32.partialorder %v438_v6, 8.507059e+37 }
 0x327   :  { %v428_v63 = vmul.f32 %v1896_v39, %v427_v62 }
 0x329   :  { %1799 = vmatmul.msk.f32.vlgmr.msrb.gmra.mxu3 %vm395_vm9, %v428_v63 }
 0x32a   :  { %v1902_v1 = vpop.eup %1901  ;;  %738 = vmatpush.msrb.mxu3 %v138_v49 }
 0x32b   :  { %v430_v2 = vmul.f32 %v1902_v1, %v413_v58  ;;  %vm435_vm14 = vweird.f32 %v1902_v1 }
 0x32c   :  { %vm436_vm1 = vmor %vm434_vm15, %vm435_vm14 }
 0x32d   :  { %v431_v3 = vsub.f32 1.0, %v430_v2 }
 0x32f   :  { %v432_v5 = vmul.f32 %v1902_v1, %v431_v3 }
 0x331   :  { %v433_v7 = vadd.f32 %v1902_v1, %v432_v5  ;;  %1805 = vmatmul.msk.f32.vlgmr.msra.gmra.mxu3 %vm185_vm0, %v2210_v59 }
 0x333   :  { %v437_v11 = vsel %vm436_vm1, %v1902_v1, %v433_v7 }
 0x334   :  { %v442_v12 = vsel %vm439_vm2, %v441_v8, %v437_v11 }
 0x335   :  { %v443_v13 = vmul.f32 %v1898_v44, %v442_v12 }
 0x337   :  { %1800 = vmatmul.msk.f32.vlgmr.msrb.gmra.mxu0 %vm395_vm9, %v443_v13  ;;  %v137_v13 = vld [vmem:[%s2693_s10 + $0x10] sm:$0xff] }
 0x338   :  { %1809 = vmatpush.xpose.msk.msrb.mxu0 %vm334_vm8, %v540_v14  ;;  %739 = vmatpush.msrb.mxu3 %v137_v13  ;;  %v167_v13 = vld [vmem:[%s2699_s16 + $0x20] sm:$0xff] }
 0x339   :  { %1806 = vmatmul.msk.f32.gmra.mxu3 %vm185_vm0, %v2219_v0 }
 0x33f   :  { %1808 = vmatmul.msk.f32.vlgmr.msra.gmra.mxu0 %vm334_vm8, %v511_v17 }
 0x340   :  { %767 = vmatpush.msra.mxu0 %v136_v18 }
 0x342   :  { %768 = vmatpush.msra.mxu0 %v135_v21 }
 0x347   :  { %1810 = vmatmul.msk.f32.vlgmr.msrb.gmra.mxu0 %vm334_vm8, %v514_v20 }
 0x3ac   :  { %v464_v22 = vpop.f32.mrf.mxu3 }
 0x3ad   :  { %1815 = vmatmul.msk.f32.vlgmr.msra.gmra.mxu0 %vm334_vm8, %v464_v22 }
 0x3b4   :  { %v487_v24 = vpop.f32.mrf.mxu0  ;;  %v562_v26 = vpop.f32.mrf.mxu3 }
 0x3b5   :  { %v563_v27 = vadd.f32 %v1867_v23, %v562_v26  ;;  %1816 = vmatmul.msk.f32.gmra.mxu0 %vm334_vm8, %v487_v24 }
 0x3b7   :  { %690 = vmatpush.msrb.mxu1 %v563_v27 }
 0x3bc   :  { %v565_v28 = vpop.f32.mrf.mxu3  ;;  %v591_v29 = vpop.f32.mrf.mxu0 }
 0x3bd   :  { %v566_v30 = vadd.f32 %v1867_v23, %v565_v28  ;;  %v620_v32 = vmul.f32 0.25, %v591_v29 }
 0x3bf   :  { %713 = vmatpush.msra.mxu2 %v566_v30  ;;  %v622_v33 = vadd.f32 %v620_v32, %v2270_v25 }
 0x3c1   :  { %v624_v34 = vsel %vm395_vm9, %v622_v33, -inf }
 0x3c2   :  { %625 = vmax.xlane.f32.xlu2 %v624_v34 }
 0x3c4   :  { %v617_v35 = vpop.f32.mrf.mxu0 }
 0x3c5   :  { %v621_v36 = vmul.f32 0.25, %v617_v35 }
 0x3c7   :  { %v623_v37 = vadd.f32 %v621_v36, %v2274_v31 }
 0x3c9   :  { %v627_v38 = vsel %vm395_vm9, %v623_v37, -inf }
 0x3ca   :  { %628 = vmax.xlane.f32.xlu0 %v627_v38 }
 0x42a   :  { %v770_v17 = vpop.f32.mrf.mxu0 }
 0x432   :  { %v773_v23 = vpop.f32.mrf.mxu0 }
 0x435   :  { %v626_v39 = vpop.xlane.xlu2 %625 }
 0x436   :  { %v630_v40 = vsub.f32 %v622_v33, %v626_v39 }
 0x438   :  { %v632_v41 = vmul.f32 1.442695, %v630_v40  ;;  %v155_v40 = vld [vmem:[%s2697_s14 + $0x10] sm:$0xff] }
 0x43a   :  { %1903 = vpow2.f32 %v632_v41  ;;  %v154_v41 = vld [vmem:[%s2697_s14 + $0x8] sm:$0xff] }
 0x43d   :  { %v629_v42 = vpop.xlane.xlu0 %628 }
 0x43e   :  { %v631_v43 = vsub.f32 %v623_v37, %v629_v42  ;;  %v153_v42 = vld [vmem:[%s2697_s14] sm:$0xff] }
 0x440   :  { %v1904_v44 = vpop.eup %1903  ;;  %v634_v45 = vmul.f32 1.442695, %v631_v43 }
 0x441   :  { %v636_v46 = vsel %vm395_vm9, %v1904_v44, 0.0 }
 0x442   :  { %1905 = vpow2.f32 %v634_v45  ;;  %637 = vadd.xlane.f32.xlu1 %v636_v46 }
 0x448   :  { %v1906_v47 = vpop.eup %1905 }
 0x449   :  { %v639_v48 = vsel %vm395_vm9, %v1906_v47, 0.0 }
 0x44a   :  { %640 = vadd.xlane.f32.xlu2 %v639_v48 }
 0x4b5   :  { %v638_v50 = vpop.xlane.xlu1 %637 }
 0x4b6   :  { %1907 = vrcp.f32 %v638_v50  ;;  %v653_v55 = vand.u32 2147483648, %v638_v50  ;;  %v651_v57 = vand.u32 2147483647, %v638_v50  ;;  %vm647_vm4 = vweird.f32 %v638_v50 }
 0x4b8   :  { %v654_v61 = vor.u32 1.1754944e-38, %v653_v55  ;;  %vm652_vm6 = vcmp.eq.f32.partialorder %v651_v57, 8.507059e+37  ;;  %v1869_v55 = vld [vmem:[%s2695_s12] ss:$0 sm:$0xff] }
 0x4bc   :  { %v1908_v51 = vpop.eup %1907 }
 0x4bd   :  { %v643_v52 = vmul.f32 %v1908_v51, %v638_v50  ;;  %v641_v53 = vpop.xlane.xlu2 %640  ;;  %vm648_vm3 = vweird.f32 %v1908_v51 }
 0x4be   :  { %1909 = vrcp.f32 %v641_v53  ;;  %vm649_vm5 = vmor %vm647_vm4, %vm648_vm3  ;;  %v668_v4 = vand.u32 2147483648, %v641_v53  ;;  %v666_v6 = vand.u32 2147483647, %v641_v53  ;;  %vm662_vm10 = vweird.f32 %v641_v53 }
 0x4bf   :  { %v644_v54 = vsub.f32 1.0, %v643_v52  ;;  %vm890_vm4 = vcmask 523264  }
 0x4c0   :  { %v669_v8 = vor.u32 1.1754944e-38, %v668_v4  ;;  %vm667_vm12 = vcmp.eq.f32.partialorder %v666_v6, 8.507059e+37 }
 0x4c1   :  { %v645_v56 = vmul.f32 %v1908_v51, %v644_v54 }
 0x4c3   :  { %v646_v58 = vadd.f32 %v1908_v51, %v645_v56 }
 0x4c4   :  { %v1910_v60 = vpop.eup %1909 }
 0x4c5   :  { %v650_v62 = vsel %vm649_vm5, %v1908_v51, %v646_v58  ;;  %v658_v63 = vmul.f32 %v1910_v60, %v641_v53  ;;  %vm663_vm7 = vweird.f32 %v1910_v60  ;;  %v1870_v58 = vld [vmem:[%s2696_s13] ss:$0 sm:$0xff] }
 0x4c6   :  { %v655_v1 = vsel %vm652_vm6, %v654_v61, %v650_v62  ;;  %vm664_vm11 = vmor %vm662_vm10, %vm663_vm7 }
 0x4c7   :  { %v659_v2 = vsub.f32 1.0, %v658_v63  ;;  %v656_v3 = vmul.f32 %v1904_v44, %v655_v1 }
 0x4c9   :  { %v660_v5 = vmul.f32 %v1910_v60, %v659_v2  ;;  %1811 = vmatmul.msk.f32.vlgmr.msrb.gmra.mxu1 %vm395_vm9, %v656_v3 }
 0x4cb   :  { %v661_v7 = vadd.f32 %v1910_v60, %v660_v5 }
 0x4cd   :  { %v665_v9 = vsel %vm664_vm11, %v1910_v60, %v661_v7 }
 0x4ce   :  { %v670_v11 = vsel %vm667_vm12, %v669_v8, %v665_v9  ;;  %v170_v9 = vld [vmem:[%s2699_s16 + $0x38] sm:$0xff] }
 0x4cf   :  { %v671_v12 = vmul.f32 %v1906_v47, %v670_v11  ;;  %905 = vmatpush.msrb.mxu2 %v170_v9  ;;  %v169_v11 = vld [vmem:[%s2699_s16 + $0x30] sm:$0xff]  ;;  %v123_v9 = vld [vmem:[%s2691_s8 + $0x40] sm:$0xff] }
 0x4d1   :  { %1812 = vmatmul.msk.f32.vlgmr.msra.gmra.mxu2 %vm395_vm9, %v671_v12  ;;  %v168_v12 = vld [vmem:[%s2699_s16 + $0x28] sm:$0xff] }
 0x4d2   :  { %906 = vmatpush.msrb.mxu2 %v169_v11 }
 0x4d4   :  { %907 = vmatpush.msrb.mxu2 %v168_v12 }
 0x4d6   :  { %908 = vmatpush.msrb.mxu2 %v167_v13 }
 0x546   :  { %v692_v14 = vpop.f32.mrf.mxu1 }
 0x547   :  { %1813 = vmatmul.msk.f32.vlgmr.msrb.gmra.mxu3 %vm334_vm8, %v692_v14  ;;  %v166_v14 = vld [vmem:[%s2699_s16 + $0x18] sm:$0xff] }
 0x548   :  { %909 = vmatpush.msrb.mxu2 %v166_v14 }
 0x554   :  { %v715_v15 = vpop.f32.mrf.mxu2 }
 0x555   :  { %1814 = vmatmul.msk.f32.gmra.mxu3 %vm334_vm8, %v715_v15  ;;  %v165_v15 = vld [vmem:[%s2699_s16 + $0x10] sm:$0xff] }
 0x556   :  { %910 = vmatpush.msrb.mxu2 %v165_v15 }
 0x5ca   :  { %v741_v18 = vpop.f32.mrf.mxu3 }
 0x5cb   :  { %v771_v19 = vadd.f32 %v770_v17, %v741_v18  ;;  %v163_v17 = vld [vmem:[%s2699_s16] sm:$0xff] }
 0x5cc   :  { %v1871_v18 = vld [vmem:[%s2698_s15] ss:$0 sm:$0xff] }
 0x5cd   :  { %v779_v20 = vadd.f32 %v1868_v16, %v771_v19 }
 0x5cf   :  { %v781_v21 = vadd.f32 %v779_v20, %v2210_v59 }
 0x5d1   :  { %v783_v22 = vsel %vm185_vm0, %v781_v21, 0.0 }
 0x5d2   :  { %784 = vadd.xlane.f32.xlu0 %v783_v22 }
 0x5d8   :  { %v744_v24 = vpop.f32.mrf.mxu3 }
 0x5d9   :  { %v774_v26 = vadd.f32 %v773_v23, %v744_v24 }
 0x5db   :  { %v780_v27 = vadd.f32 %v1868_v16, %v774_v26  ;;  %v164_v16 = vld [vmem:[%s2699_s16 + $0x8] sm:$0xff] }
 0x5dc   :  { %911 = vmatpush.msrb.mxu2 %v164_v16 }
 0x5dd   :  { %v782_v28 = vadd.f32 %v780_v27, %v2219_v0  ;;  %v156_v0 = vld [vmem:[%s2697_s14 + $0x18] sm:$0xff] }
 0x5de   :  { %858 = vmatpush.msra.mxu1 %v156_v0  ;;  %912 = vmatpush.msrb.mxu2 %v163_v17 }
 0x5df   :  { %v786_v29 = vsel %vm185_vm0, %v782_v28, 0.0 }
 0x5e0   :  { %787 = vadd.xlane.f32.xlu1 %v786_v29  ;;  %859 = vmatpush.msra.mxu1 %v155_v40 }
 0x5e2   :  { %860 = vmatpush.msra.mxu1 %v154_v41  ;;  %v1872_v41 = vld [vmem:[%s2700_s17] ss:$0 sm:$0xff] }
 0x5e4   :  { %861 = vmatpush.msra.mxu1 %v153_v42 }
 0x645   :  { %v785_v30 = vpop.xlane.xlu0 %784 }
 0x646   :  { %v789_v32 = vmul.f32 %v785_v30, %v2139_v10 }
 0x648   :  { %v791_v33 = vsub.f32 %v781_v21, %v789_v32 }
 0x64a   :  { %v793_v34 = vmul.f32 %v791_v33, %v791_v33 }
 0x64c   :  { %v795_v35 = vsel %vm185_vm0, %v793_v34, 0.0 }
 0x64d   :  { %796 = vadd.xlane.f32.xlu2 %v795_v35 }
 0x653   :  { %v788_v59 = vpop.xlane.xlu1 %787 }
 0x654   :  { %v790_v36 = vmul.f32 %v788_v59, %v2139_v10 }
 0x656   :  { %v792_v37 = vsub.f32 %v782_v28, %v790_v36 }
 0x658   :  { %v794_v38 = vmul.f32 %v792_v37, %v792_v37 }
 0x65a   :  { %v798_v39 = vsel %vm185_vm0, %v794_v38, 0.0 }
 0x65b   :  { %799 = vadd.xlane.f32.xlu0 %v798_v39 }
 0x6c0   :  { %v797_v43 = vpop.xlane.xlu2 %796 }
 0x6c1   :  { %v801_v44 = vmul.f32 %v797_v43, %v2139_v10 }
 0x6c3   :  { %v803_v45 = vadd.f32 1e-12, %v801_v44 }
 0x6c5   :  { %1911 = vrsqrt.f32 %v803_v45  ;;  %vm811_vm14 = vweird.f32 %v803_v45 }
 0x6cb   :  { %v1912_v46 = vpop.eup %1911 }
 0x6cc   :  { %v806_v47 = vmul.f32 %v1912_v46, %v803_v45  ;;  %vm812_vm13 = vweird.f32 %v1912_v46 }
 0x6cd   :  { %vm813_vm15 = vmor %vm811_vm14, %vm812_vm13 }
 0x6ce   :  { %v807_v48 = vmul.f32 %v1912_v46, %v806_v47  ;;  %v800_v49 = vpop.xlane.xlu0 %799 }
 0x6cf   :  { %v802_v50 = vmul.f32 %v800_v49, %v2139_v10 }
 0x6d0   :  { %v808_v51 = vmul.f32 0.5, %v807_v48 }
 0x6d1   :  { %v804_v52 = vadd.f32 1e-12, %v802_v50 }
 0x6d2   :  { %v809_v53 = vsub.f32 1.5, %v808_v51 }
 0x6d3   :  { %1913 = vrsqrt.f32 %v804_v52  ;;  %vm821_vm2 = vweird.f32 %v804_v52 }
 0x6d4   :  { %v810_v54 = vmul.f32 %v1912_v46, %v809_v53 }
 0x6d6   :  { %v814_v56 = vsel %vm813_vm15, %v1912_v46, %v810_v54 }
 0x6d7   :  { %v825_v57 = vmul.f32 %v814_v56, %v791_v33 }
 0x6d9   :  { %v1914_v60 = vpop.eup %1913  ;;  %v830_v61 = vmul.f32 %v1869_v55, %v825_v57 }
 0x6da   :  { %v816_v62 = vmul.f32 %v1914_v60, %v804_v52  ;;  %vm822_vm1 = vweird.f32 %v1914_v60 }
 0x6db   :  { %v835_v63 = vadd.f32 %v1870_v58, %v830_v61  ;;  %vm823_vm3 = vmor %vm821_vm2, %vm822_vm1  ;;  %v86_v61 = vld [vmem:[%s2721_s2 + $0x58] sm:$0xff] }
 0x6dc   :  { %v817_v1 = vmul.f32 %v1914_v60, %v816_v62  ;;  %v106_v62 = vld [vmem:[%s2722_s7 + $0x58] sm:$0xff]  ;;  %997 = vmatpush.msra.mxu3 %v86_v61 }
 0x6dd   :  { %1817 = vmatmul.msk.f32.vlgmr.msra.gmra.mxu1 %vm185_vm0, %v835_v63  ;;  %1023 = vmatpush.msrb.mxu0 %v106_v62  ;;  %v107_v62 = vld [vmem:[%s2722_s7 + $0x60] sm:$0xff] }
 0x6de   :  { %v818_v2 = vmul.f32 0.5, %v817_v1  ;;  %v85_v1 = vld [vmem:[%s2721_s2 + $0x50] sm:$0xff] }
 0x6df   :  { %998 = vmatpush.msra.mxu3 %v85_v1 }
 0x6e0   :  { %v819_v3 = vsub.f32 1.5, %v818_v2  ;;  %v105_v2 = vld [vmem:[%s2722_s7 + $0x50] sm:$0xff] }
 0x6e1   :  { %1024 = vmatpush.msrb.mxu0 %v105_v2 }
 0x6e2   :  { %v820_v4 = vmul.f32 %v1914_v60, %v819_v3  ;;  %v125_v3 = vld [vmem:[%s2691_s8 + $0x50] sm:$0xff] }
 0x6e4   :  { %v824_v5 = vsel %vm823_vm3, %v1914_v60, %v820_v4  ;;  %v84_v4 = vld [vmem:[%s2721_s2 + $0x48] sm:$0xff] }
 0x6e5   :  { %v826_v6 = vmul.f32 %v824_v5, %v792_v37  ;;  %v104_v5 = vld [vmem:[%s2722_s7 + $0x48] sm:$0xff]  ;;  %999 = vmatpush.msra.mxu3 %v84_v4 }
 0x6e6   :  { %1025 = vmatpush.msrb.mxu0 %v104_v5 }
 0x6e7   :  { %v831_v7 = vmul.f32 %v1869_v55, %v826_v6  ;;  %v124_v6 = vld [vmem:[%s2691_s8 + $0x48] sm:$0xff] }
 0x6e9   :  { %v836_v8 = vadd.f32 %v1870_v58, %v831_v7  ;;  %v83_v7 = vld [vmem:[%s2721_s2 + $0x40] sm:$0xff] }
 0x6ea   :  { %1000 = vmatpush.msra.mxu3 %v83_v7 }
 0x6eb   :  { %1818 = vmatmul.msk.f32.gmra.mxu1 %vm185_vm0, %v836_v8 }
 0x75a   :  { %v863_v19 = vpop.f32.mrf.mxu1 }
 0x75b   :  { %v864_v20 = vadd.f32 %v1871_v18, %v863_v19 }
 0x75d   :  { %v869_v21 = vmul.f32 %v864_v20, %v864_v20 }
 0x75f   :  { %v871_v22 = vmul.f32 %v869_v21, %v864_v20 }
 0x761   :  { %v873_v23 = vmul.f32 0.044715, %v871_v22 }
 0x763   :  { %v875_v24 = vadd.f32 %v873_v23, %v864_v20  ;;  %v1873_v23 = vld [vmem:[%s2701_s18] ss:$0 sm:$0xff] }
 0x765   :  { %v877_v26 = vmul.f32 0.7978846, %v875_v24 }
 0x767   :  { %1915 = vtanh.f32 %v877_v26  ;;  %v1874_v26 = vld [vmem:[%s2702_s19] ss:$0 sm:$0xff] }
 0x768   :  { %v866_v27 = vpop.f32.mrf.mxu1 }
 0x769   :  { %v867_v28 = vadd.f32 %v1871_v18, %v866_v27 }
 0x76b   :  { %v870_v29 = vmul.f32 %v867_v28, %v867_v28 }
 0x76d   :  { %v1916_v30 = vpop.eup %1915  ;;  %v872_v32 = vmul.f32 %v870_v29, %v867_v28 }
 0x76e   :  { %v881_v33 = vadd.f32 1.0, %v1916_v30 }
 0x76f   :  { %v874_v34 = vmul.f32 0.044715, %v872_v32 }
 0x770   :  { %v883_v35 = vmul.f32 0.5, %v881_v33 }
 0x771   :  { %v876_v59 = vadd.f32 %v874_v34, %v867_v28 }
 0x772   :  { %v885_v36 = vmul.f32 %v883_v35, %v864_v20 }
 0x773   :  { %v878_v37 = vmul.f32 0.7978846, %v876_v59 }
 0x774   :  { %1819 = vmatmul.msk.f32.vlgmr.msrb.gmra.mxu2 %vm890_vm4, %v885_v36 }
 0x775   :  { %1917 = vtanh.f32 %v878_v37 }
 0x77b   :  { %v1918_v38 = vpop.eup %1917 }
 0x77c   :  { %v882_v39 = vadd.f32 1.0, %v1918_v38 }
 0x77e   :  { %v884_v0 = vmul.f32 0.5, %v882_v39 }
 0x780   :  { %v886_v40 = vmul.f32 %v884_v0, %v867_v28  ;;  %v1875_v0 = vld [vmem:[%s2725_s26 + $0x2] ss:$0 sm:$0xff] }
 0x782   :  { %1820 = vmatmul.msk.f32.gmra.mxu2 %vm890_vm4, %v886_v40  ;;  %v1876_v40 = vld [vmem:[%s2692_s9 + $0x2] ss:$0 sm:$0xff] }
 0x7f7   :  { %v914_v42 = vpop.f32.mrf.mxu2 }
 0x7f8   :  { %v915_v43 = vadd.f32 %v1872_v41, %v914_v42 }
 0x7fa   :  { %v920_v44 = vadd.f32 %v915_v43, %v835_v63  ;;  %v126_v63 = vld [vmem:[%s2691_s8 + $0x58] sm:$0xff] }
 0x7fb   :  { %1049 = vmatpush.msrb.mxu1 %v126_v63 }
 0x7fc   :  { %v922_v45 = vsel %vm185_vm0, %v920_v44, 0.0 }
 0x7fd   :  { %923 = vadd.xlane.f32.xlu1 %v922_v45  ;;  %1050 = vmatpush.msrb.mxu1 %v125_v3 }
 0x7ff   :  { %1051 = vmatpush.msrb.mxu1 %v124_v6 }
 0x801   :  { %1052 = vmatpush.msrb.mxu1 %v123_v9 }
 0x805   :  { %v917_v46 = vpop.f32.mrf.mxu2 }
 0x806   :  { %v918_v47 = vadd.f32 %v1872_v41, %v917_v46  ;;  %v1877_v46 = vld [vmem:[%s2726_s28 + $0x2] ss:$0 sm:$0xff] }
 0x808   :  { %v921_v48 = vadd.f32 %v918_v47, %v836_v8  ;;  %v103_v8 = vld [vmem:[%s2722_s7 + $0x40] sm:$0xff]  ;;  %v89_v47 = vld [vmem:[%s2721_s2 + $0x70] sm:$0xff] }
 0x809   :  { %1026 = vmatpush.msrb.mxu0 %v103_v8  ;;  %v2520_v8 = vld [vmem:[%s2725_s26 + $0x3] ss:$0 sm:$0xff] }
 0x80a   :  { %v925_v49 = vsel %vm185_vm0, %v921_v48, 0.0 }
 0x80b   :  { %926 = vadd.xlane.f32.xlu2 %v925_v49 }
 0x870   :  { %v924_v50 = vpop.xlane.xlu1 %923 }
 0x871   :  { %v928_v51 = vmul.f32 %v924_v50, %v2139_v10 }
 0x873   :  { %v930_v52 = vsub.f32 %v920_v44, %v928_v51  ;;  %v90_v44 = vld [vmem:[%s2721_s2 + $0x78] sm:$0xff]  ;;  %v87_v51 = vld [vmem:[%s2721_s2 + $0x60] sm:$0xff] }
 0x875   :  { %v932_v53 = vmul.f32 %v930_v52, %v930_v52 }
 0x877   :  { %v934_v54 = vsel %vm185_vm0, %v932_v53, 0.0 }
 0x878   :  { %935 = vadd.xlane.f32.xlu0 %v934_v54 }
 0x87e   :  { %v927_v55 = vpop.xlane.xlu2 %926 }
 0x87f   :  { %v929_v56 = vmul.f32 %v927_v55, %v2139_v10  ;;  %v110_v55 = vld [vmem:[%s2722_s7 + $0x78] sm:$0xff] }
 0x881   :  { %v2402_v57 = vsub.f32 %v921_v48, %v929_v56  ;;  %v88_v48 = vld [vmem:[%s2721_s2 + $0x68] sm:$0xff] }
 0x883   :  { %v933_v58 = vmul.f32 %v2402_v57, %v2402_v57 }
 0x885   :  { %v937_v60 = vsel %vm185_vm0, %v933_v58, 0.0  ;;  %v108_v58 = vld [vmem:[%s2722_s7 + $0x68] sm:$0xff] }
 0x886   :  { %938 = vadd.xlane.f32.xlu1 %v937_v60 }
 0x8eb   :  { %v936_v11 = vpop.xlane.xlu0 %935 }
 0x8ec   :  { %v940_v12 = vmul.f32 %v936_v11, %v2139_v10 }
 0x8ee   :  { %v942_v13 = vadd.f32 1e-12, %v940_v12 }
 0x8f0   :  { %1919 = vrsqrt.f32 %v942_v13  ;;  %vm950_vm6 = vweird.f32 %v942_v13 }
 0x8f6   :  { %v1920_v14 = vpop.eup %1919 }
 0x8f7   :  { %v945_v15 = vmul.f32 %v1920_v14, %v942_v13  ;;  %vm951_vm5 = vweird.f32 %v1920_v14 }
 0x8f8   :  { %vm952_vm7 = vmor %vm950_vm6, %vm951_vm5 }
 0x8f9   :  { %v946_v16 = vmul.f32 %v1920_v14, %v945_v15  ;;  %v939_v17 = vpop.xlane.xlu1 %938 }
 0x8fa   :  { %v941_v18 = vmul.f32 %v939_v17, %v2139_v10 }
 0x8fb   :  { %v947_v19 = vmul.f32 0.5, %v946_v16 }
 0x8fc   :  { %v943_v20 = vadd.f32 1e-12, %v941_v18 }
 0x8fd   :  { %v948_v21 = vsub.f32 1.5, %v947_v19 }
 0x8fe   :  { %1921 = vrsqrt.f32 %v943_v20  ;;  %vm960_vm11 = vweird.f32 %v943_v20 }
 0x8ff   :  { %v949_v22 = vmul.f32 %v1920_v14, %v948_v21 }
 0x901   :  { %v953_v24 = vsel %vm952_vm7, %v1920_v14, %v949_v22  ;;  %v130_v22 = vld [vmem:[%s2691_s8 + $0x78] sm:$0xff] }
 0x902   :  { %v964_v27 = vmul.f32 %v953_v24, %v930_v52  ;;  %v128_v24 = vld [vmem:[%s2691_s8 + $0x68] sm:$0xff] }
 0x904   :  { %v1922_v28 = vpop.eup %1921  ;;  %v969_v29 = vmul.f32 %v1873_v23, %v964_v27 }
 0x905   :  { %v955_v30 = vmul.f32 %v1922_v28, %v943_v20  ;;  %vm961_vm10 = vweird.f32 %v1922_v28 }
 0x906   :  { %v2451_v32 = vadd.f32 %v1874_v26, %v969_v29  ;;  %vm962_vm12 = vmor %vm960_vm11, %vm961_vm10 }
 0x907   :  { %v956_v33 = vmul.f32 %v1922_v28, %v955_v30 }
 0x908   :  { %1821 = vmatmul.msk.f32.vlgmr.msra.gmra.mxu3 %vm185_vm0, %v2451_v32  ;;  %1823 = vmatmul.msk.f32.vlgmr.msrb.gmra.mxu0 %vm185_vm0, %v2451_v32 }
 0x909   :  { %v957_v34 = vmul.f32 0.5, %v956_v33  ;;  %1825 = vmatmul.msk.f32.vlgmr.msrb.gmra.mxu1 %vm185_vm0, %v2451_v32 }
 0x90b   :  { %v958_v35 = vsub.f32 1.5, %v957_v34 }
 0x90d   :  { %v959_v59 = vmul.f32 %v1922_v28, %v958_v35 }
 0x90f   :  { %v963_v36 = vsel %vm962_vm12, %v1922_v28, %v959_v59 }
 0x910   :  { %v965_v37 = vmul.f32 %v963_v36, %v2402_v57  ;;  %v109_v57 = vld [vmem:[%s2722_s7 + $0x70] sm:$0xff] }
 0x912   :  { %v970_v38 = vmul.f32 %v1873_v23, %v965_v37  ;;  %v129_v23 = vld [vmem:[%s2691_s8 + $0x70] sm:$0xff] }
 0x914   :  { %v2460_v39 = vadd.f32 %v1874_v26, %v970_v38  ;;  %v127_v26 = vld [vmem:[%s2691_s8 + $0x60] sm:$0xff] }
 0x916   :  { %1822 = vmatmul.msk.f32.gmra.mxu3 %vm185_vm0, %v2460_v39  ;;  %1824 = vmatmul.msk.f32.gmra.mxu0 %vm185_vm0, %v2460_v39 }
 0x917   :  { %1826 = vmatmul.msk.f32.gmra.mxu1 %vm185_vm0, %v2460_v39 }
 0x985   :  { %v1028_v41 = vpop.f32.mrf.mxu0 }
 0x986   :  { %v1029_v42 = vadd.f32 %v1875_v0, %v1028_v41  ;;  %v1054_v43 = vpop.f32.mrf.mxu1 }
 0x987   :  { %v1055_v45 = vadd.f32 %v1876_v40, %v1054_v43 }
 0x988   :  { %1827 = vmatpush.xpose.msk.msra.mxu2 %vm334_vm8, %v1029_v42 }
 0x989   :  { %1182 = vmatpush.msra.mxu0 %v1055_v45 }
 0x98b   :  { %v1002_v49 = vpop.f32.mrf.mxu3  ;;  %1277 = vmatpush.msrb.mxu0 %v130_v22 }
 0x98c   :  { %1225 = vmatpush.msrb.mxu2 %v90_v44  ;;  %v1003_v50 = vadd.f32 %v1877_v46, %v1002_v49 }
 0x98d   :  { %1278 = vmatpush.msrb.mxu0 %v129_v23 }
 0x98e   :  { %1226 = vmatpush.msrb.mxu2 %v89_v47 }
 0x98f   :  { %1828 = vmatmul.msk.f32.vlgmr.msra.gmra.mxu2 %vm334_vm8, %v1003_v50  ;;  %1279 = vmatpush.msrb.mxu0 %v128_v24 }
 0x990   :  { %1227 = vmatpush.msrb.mxu2 %v88_v48 }
 0x991   :  { %1280 = vmatpush.msrb.mxu0 %v127_v26 }
 0x992   :  { %1228 = vmatpush.msrb.mxu2 %v87_v51 }
 0x993   :  { %v1031_v52 = vpop.f32.mrf.mxu0 }
 0x994   :  { %v1032_v53 = vadd.f32 %v1875_v0, %v1031_v52  ;;  %v1057_v54 = vpop.f32.mrf.mxu1 }
 0x995   :  { %v1058_v56 = vadd.f32 %v1876_v40, %v1057_v54 }
 0x996   :  { %1829 = vmatpush.xpose.msk.msrb.mxu3 %vm334_vm8, %v1032_v53 }
 0x997   :  { %1833 = vmatmul.msk.f32.vlgmr.msrb.gmra.mxu2 %vm185_vm0, %v2451_v32  ;;  %1205 = vmatpush.msra.mxu1 %v1058_v56 }
 0x999   :  { %v1005_v60 = vpop.f32.mrf.mxu3 }
 0x99a   :  { %1251 = vmatpush.msra.mxu3 %v110_v55  ;;  %v1006_v61 = vadd.f32 %v1877_v46, %v1005_v60  ;;  %v1878_v55 = vld [vmem:[%s2726_s28 + $0x3] ss:$0 sm:$0xff] }
 0x99c   :  { %1252 = vmatpush.msra.mxu3 %v109_v57  ;;  %v140_v57 = vld [vmem:[%s2693_s10 + $0x28] sm:$0xff] }
 0x99d   :  { %1830 = vmatmul.msk.f32.vlgmr.msrb.gmra.mxu3 %vm334_vm8, %v1006_v61  ;;  %v139_v61 = vld [vmem:[%s2693_s10 + $0x20] sm:$0xff] }
 0x99e   :  { %1253 = vmatpush.msra.mxu3 %v108_v58 }
 0x99f   :  { %1834 = vmatmul.msk.f32.gmra.mxu2 %vm185_vm0, %v2460_v39 }
 0x9a0   :  { %1254 = vmatpush.msra.mxu3 %v107_v62 }
 0x9a5   :  { %1835 = vmatmul.msk.f32.vlgmr.msra.gmra.mxu3 %vm185_vm0, %v2451_v32 }
 0x9ad   :  { %1836 = vmatmul.msk.f32.gmra.mxu3 %vm185_vm0, %v2460_v39 }
 0xa12   :  { %v1083_v63 = vpop.f32.mrf.mxu2 }
 0xa13   :  { %v1112_v1 = vmul.f32 0.25, %v1083_v63  ;;  %v1880_v63 = vld [vmem:[%s2692_s9 + $0x3] ss:$0 sm:$0xff] }
 0xa15   :  { %v1114_v2 = vadd.f32 %v1112_v1, %v2270_v25 }
 0xa17   :  { %v1116_v3 = vsel %vm395_vm9, %v1114_v2, -inf }
 0xa18   :  { %1117 = vmax.xlane.f32.xlu1 %v1116_v3 }
 0xa1a   :  { %v1230_v54 = vpop.f32.mrf.mxu2 }
 0xa1b   :  { %v1231_v56 = vadd.f32 %v1878_v55, %v1230_v54 }
 0xa20   :  { %v1109_v4 = vpop.f32.mrf.mxu3 }
 0xa21   :  { %v1113_v5 = vmul.f32 0.25, %v1109_v4 }
 0xa22   :  { %v1233_v58 = vpop.f32.mrf.mxu2 }
 0xa23   :  { %v1115_v6 = vadd.f32 %v1113_v5, %v2274_v31  ;;  %v1234_v60 = vadd.f32 %v1878_v55, %v1233_v58 }
 0xa25   :  { %v1119_v7 = vsel %vm395_vm9, %v1115_v6, -inf }
 0xa26   :  { %1120 = vmax.xlane.f32.xlu2 %v1119_v7 }
 0xa28   :  { %v1256_v9 = vpop.f32.mrf.mxu3 }
 0xa29   :  { %v1257_v11 = vadd.f32 %v2520_v8, %v1256_v9 }
 0xa2b   :  { %1839 = vmatpush.xpose.msk.msrb.mxu1 %vm334_vm8, %v1257_v11 }
 0xa30   :  { %v1259_v49 = vpop.f32.mrf.mxu3 }
 0xa31   :  { %v1260_v53 = vadd.f32 %v2520_v8, %v1259_v49 }
 0xa8b   :  { %v1118_v12 = vpop.xlane.xlu1 %1117 }
 0xa8c   :  { %v1122_v13 = vsub.f32 %v1114_v2, %v1118_v12 }
 0xa8e   :  { %v1124_v14 = vmul.f32 1.442695, %v1122_v13 }
 0xa90   :  { %1923 = vpow2.f32 %v1124_v14 }
 0xa96   :  { %v1924_v15 = vpop.eup %1923 }
 0xa97   :  { %v1128_v16 = vsel %vm395_vm9, %v1924_v15, 0.0 }
 0xa98   :  { %1129 = vadd.xlane.f32.xlu2 %v1128_v16 }
 0xa99   :  { %v1121_v17 = vpop.xlane.xlu2 %1120 }
 0xa9a   :  { %v1123_v18 = vsub.f32 %v1115_v6, %v1121_v17 }
 0xa9c   :  { %v1126_v19 = vmul.f32 1.442695, %v1123_v18 }
 0xa9e   :  { %1925 = vpow2.f32 %v1126_v19 }
 0xaa4   :  { %v1926_v20 = vpop.eup %1925 }
 0xaa5   :  { %v1131_v21 = vsel %vm395_vm9, %v1926_v20, 0.0 }
 0xaa6   :  { %1132 = vadd.xlane.f32.xlu0 %v1131_v21 }
 0xb0b   :  { %v1130_v27 = vpop.xlane.xlu2 %1129 }
 0xb0c   :  { %1927 = vrcp.f32 %v1130_v27  ;;  %v1145_v33 = vand.u32 2147483648, %v1130_v27  ;;  %v1143_v35 = vand.u32 2147483647, %v1130_v27  ;;  %vm1139_vm14 = vweird.f32 %v1130_v27 }
 0xb0e   :  { %v1146_v37 = vor.u32 1.1754944e-38, %v1145_v33  ;;  %vm1144_vm1 = vcmp.eq.f32.partialorder %v1143_v35, 8.507059e+37 }
 0xb12   :  { %v1928_v28 = vpop.eup %1927 }
 0xb13   :  { %v1135_v29 = vmul.f32 %v1928_v28, %v1130_v27  ;;  %vm1140_vm13 = vweird.f32 %v1928_v28 }
 0xb14   :  { %vm1141_vm15 = vmor %vm1139_vm14, %vm1140_vm13 }
 0xb15   :  { %v1136_v30 = vsub.f32 1.0, %v1135_v29 }
 0xb17   :  { %v1137_v34 = vmul.f32 %v1928_v28, %v1136_v30 }
 0xb19   :  { %v1138_v59 = vadd.f32 %v1928_v28, %v1137_v34  ;;  %v1133_v36 = vpop.xlane.xlu0 %1132 }
 0xb1a   :  { %1929 = vrcp.f32 %v1133_v36  ;;  %v1160_v44 = vand.u32 2147483648, %v1133_v36  ;;  %v1158_v46 = vand.u32 2147483647, %v1133_v36  ;;  %vm1154_vm3 = vweird.f32 %v1133_v36 }
 0xb1b   :  { %v1142_v38 = vsel %vm1141_vm15, %v1928_v28, %v1138_v59 }
 0xb1c   :  { %v1147_v0 = vsel %vm1144_vm1, %v1146_v37, %v1142_v38  ;;  %v1161_v48 = vor.u32 1.1754944e-38, %v1160_v44  ;;  %vm1159_vm6 = vcmp.eq.f32.partialorder %v1158_v46, 8.507059e+37 }
 0xb1d   :  { %v1148_v40 = vmul.f32 %v1924_v15, %v1147_v0 }
 0xb1f   :  { %1831 = vmatmul.msk.f32.vlgmr.msra.gmra.mxu0 %vm395_vm9, %v1148_v40 }
 0xb20   :  { %v1930_v41 = vpop.eup %1929 }
 0xb21   :  { %v1150_v42 = vmul.f32 %v1930_v41, %v1133_v36  ;;  %vm1155_vm2 = vweird.f32 %v1930_v41 }
 0xb22   :  { %vm1156_vm5 = vmor %vm1154_vm3, %vm1155_vm2 }
 0xb23   :  { %v1151_v43 = vsub.f32 1.0, %v1150_v42 }
 0xb25   :  { %v1152_v45 = vmul.f32 %v1930_v41, %v1151_v43 }
 0xb27   :  { %v1153_v47 = vadd.f32 %v1930_v41, %v1152_v45  ;;  %1837 = vmatmul.msk.f32.vlgmr.msrb.gmra.mxu0 %vm185_vm0, %v2451_v32 }
 0xb29   :  { %v1157_v50 = vsel %vm1156_vm5, %v1930_v41, %v1153_v47 }
 0xb2a   :  { %v1162_v51 = vsel %vm1159_vm6, %v1161_v48, %v1157_v50  ;;  %v141_v50 = vld [vmem:[%s2693_s10 + $0x30] sm:$0xff] }
 0xb2b   :  { %v1163_v52 = vmul.f32 %v1926_v20, %v1162_v51 }
 0xb2d   :  { %1832 = vmatmul.msk.f32.vlgmr.msra.gmra.mxu1 %vm395_vm9, %v1163_v52 }
 0xb2e   :  { %1841 = vmatpush.xpose.msk.msra.mxu1 %vm334_vm8, %v1260_v53  ;;  %v1881_v53 = vld [vmem:[%s2694_s11 + $0x1] ss:$0 sm:$0xff] }
 0xb2f   :  { %1838 = vmatmul.msk.f32.gmra.mxu0 %vm185_vm0, %v2460_v39 }
 0xb35   :  { %1840 = vmatmul.msk.f32.vlgmr.msrb.gmra.mxu1 %vm334_vm8, %v1231_v56 }
 0xb36   :  { %1487 = vmatpush.msrb.mxu1 %v140_v57 }
 0xb38   :  { %1488 = vmatpush.msrb.mxu1 %v139_v61 }
 0xb3d   :  { %1842 = vmatmul.msk.f32.vlgmr.msra.gmra.mxu1 %vm334_vm8, %v1234_v60 }
 0xb9c   :  { %v1184_v62 = vpop.f32.mrf.mxu0 }
 0xb9d   :  { %1847 = vmatmul.msk.f32.vlgmr.msrb.gmra.mxu1 %vm334_vm8, %v1184_v62 }
 0xba4   :  { %v1282_v1 = vpop.f32.mrf.mxu0 }
 0xba5   :  { %v1283_v2 = vadd.f32 %v1880_v63, %v1282_v1 }
 0xba7   :  { %1410 = vmatpush.msra.mxu2 %v1283_v2 }
 0xbaa   :  { %v1207_v3 = vpop.f32.mrf.mxu1 }
 0xbab   :  { %1848 = vmatmul.msk.f32.gmra.mxu1 %vm334_vm8, %v1207_v3 }
 0xbac   :  { %v1285_v4 = vpop.f32.mrf.mxu0 }
 0xbad   :  { %v1286_v5 = vadd.f32 %v1880_v63, %v1285_v4 }
 0xbaf   :  { %1433 = vmatpush.msrb.mxu3 %v1286_v5 }
 0xbb2   :  { %v1311_v6 = vpop.f32.mrf.mxu1 }
 0xbb3   :  { %v1340_v7 = vmul.f32 0.25, %v1311_v6 }
 0xbb5   :  { %v1342_v8 = vadd.f32 %v1340_v7, %v2270_v25 }
 0xbb7   :  { %v1344_v9 = vsel %vm395_vm9, %v1342_v8, -inf }
 0xbb8   :  { %1345 = vmax.xlane.f32.xlu0 %v1344_v9 }
 0xbba   :  { %v1337_v11 = vpop.f32.mrf.mxu1 }
 0xbbb   :  { %v1341_v12 = vmul.f32 0.25, %v1337_v11 }
 0xbbd   :  { %v1343_v13 = vadd.f32 %v1341_v12, %v2274_v31  ;;  %v142_v31 = vld [vmem:[%s2693_s10 + $0x38] sm:$0xff]  ;;  %s2009_s10 = smov 8  }
 0xbbe   :  { %1458 = vmatpush.msra.mxu0 %v142_v31 }
 0xbbf   :  { %v1347_v14 = vsel %vm395_vm9, %v1343_v13, -inf }
 0xbc0   :  { %1348 = vmax.xlane.f32.xlu1 %v1347_v14  ;;  %1459 = vmatpush.msra.mxu0 %v141_v50  ;;  %v159_v14 = vld [vmem:[%s2697_s14 + $0x30] sm:$0xff] }
 0xbc1   :  { %v173_v50 = vld [vmem:[%s2699_s16 + $0x50] sm:$0xff] }
 0xc1a   :  { %v1490_v54 = vpop.f32.mrf.mxu1 }
 0xc28   :  { %v1493_v61 = vpop.f32.mrf.mxu1 }
 0xc2b   :  { %v1346_v15 = vpop.xlane.xlu0 %1345 }
 0xc2c   :  { %v1350_v16 = vsub.f32 %v1342_v8, %v1346_v15  ;;  %v158_v15 = vld [vmem:[%s2697_s14 + $0x28] sm:$0xff] }
 0xc2e   :  { %v1352_v17 = vmul.f32 1.442695, %v1350_v16  ;;  %v157_v16 = vld [vmem:[%s2697_s14 + $0x20] sm:$0xff] }
 0xc30   :  { %1931 = vpow2.f32 %v1352_v17 }
 0xc33   :  { %v1349_v18 = vpop.xlane.xlu1 %1348 }
 0xc34   :  { %v1351_v19 = vsub.f32 %v1343_v13, %v1349_v18 }
 0xc36   :  { %v1932_v20 = vpop.eup %1931  ;;  %v1354_v21 = vmul.f32 1.442695, %v1351_v19 }
 0xc37   :  { %v1356_v25 = vsel %vm395_vm9, %v1932_v20, 0.0 }
 0xc38   :  { %1933 = vpow2.f32 %v1354_v21  ;;  %1357 = vadd.xlane.f32.xlu2 %v1356_v25 }
 0xc3e   :  { %v1934_v22 = vpop.eup %1933 }
 0xc3f   :  { %v1359_v23 = vsel %vm395_vm9, %v1934_v22, 0.0 }
 0xc40   :  { %1360 = vadd.xlane.f32.xlu0 %v1359_v23 }
 0xcab   :  { %v1358_v24 = vpop.xlane.xlu2 %1357 }
 0xcac   :  { %1935 = vrcp.f32 %v1358_v24  ;;  %v1373_v30 = vand.u32 2147483648, %v1358_v24  ;;  %v1371_v34 = vand.u32 2147483647, %v1358_v24  ;;  %vm1367_vm10 = vweird.f32 %v1358_v24 }
 0xcae   :  { %v1374_v36 = vor.u32 1.1754944e-38, %v1373_v30  ;;  %vm1372_vm12 = vcmp.eq.f32.partialorder %v1371_v34, 8.507059e+37  ;;  %v1882_v30 = vld [vmem:[%s2695_s12 + $0x1] ss:$0 sm:$0xff] }
 0xcb2   :  { %v1936_v26 = vpop.eup %1935 }
 0xcb3   :  { %v1363_v27 = vmul.f32 %v1936_v26, %v1358_v24  ;;  %v1361_v28 = vpop.xlane.xlu0 %1360  ;;  %vm1368_vm7 = vweird.f32 %v1936_v26 }
 0xcb4   :  { %1937 = vrcp.f32 %v1361_v28  ;;  %vm1369_vm11 = vmor %vm1367_vm10, %vm1368_vm7  ;;  %v1388_v42 = vand.u32 2147483648, %v1361_v28  ;;  %v1386_v44 = vand.u32 2147483647, %v1361_v28  ;;  %vm1382_vm14 = vweird.f32 %v1361_v28 }
 0xcb5   :  { %v1364_v29 = vsub.f32 1.0, %v1363_v27 }
 0xcb6   :  { %v1389_v46 = vor.u32 1.1754944e-38, %v1388_v42  ;;  %vm1387_vm1 = vcmp.eq.f32.partialorder %v1386_v44, 8.507059e+37 }
 0xcb7   :  { %v1365_v33 = vmul.f32 %v1936_v26, %v1364_v29 }
 0xcb9   :  { %v1366_v35 = vadd.f32 %v1936_v26, %v1365_v33 }
 0xcba   :  { %v1938_v59 = vpop.eup %1937 }
 0xcbb   :  { %v1370_v37 = vsel %vm1369_vm11, %v1936_v26, %v1366_v35  ;;  %v1378_v38 = vmul.f32 %v1938_v59, %v1361_v28  ;;  %vm1383_vm13 = vweird.f32 %v1938_v59 }
 0xcbc   :  { %v1375_v0 = vsel %vm1372_vm12, %v1374_v36, %v1370_v37  ;;  %vm1384_vm15 = vmor %vm1382_vm14, %vm1383_vm13 }
 0xcbd   :  { %v1379_v40 = vsub.f32 1.0, %v1378_v38  ;;  %v1376_v41 = vmul.f32 %v1932_v20, %v1375_v0 }
 0xcbf   :  { %v1380_v43 = vmul.f32 %v1938_v59, %v1379_v40  ;;  %1843 = vmatmul.msk.f32.vlgmr.msra.gmra.mxu2 %vm395_vm9, %v1376_v41 }
 0xcc1   :  { %v1381_v45 = vadd.f32 %v1938_v59, %v1380_v43 }
 0xcc3   :  { %v1385_v47 = vsel %vm1384_vm15, %v1938_v59, %v1381_v45  ;;  %v1883_v59 = vld [vmem:[%s2696_s13 + $0x1] ss:$0 sm:$0xff]  ;;  %v178_v45 = vld [vmem:[%s2699_s16 + $0x78] sm:$0xff]  ;;  %vm1730_vm15 = vcmask 1041409  }
 0xcc4   :  { %v1390_v48 = vsel %vm1387_vm1, %v1389_v46, %v1385_v47  ;;  %1624 = vmatpush.msra.mxu3 %v178_v45  ;;  %v177_v46 = vld [vmem:[%s2699_s16 + $0x70] sm:$0xff]  ;;  %v176_v47 = vld [vmem:[%s2699_s16 + $0x68] sm:$0xff] }
 0xcc5   :  { %v1391_v49 = vmul.f32 %v1934_v22, %v1390_v48  ;;  %v175_v48 = vld [vmem:[%s2699_s16 + $0x60] sm:$0xff] }
 0xcc6   :  { %1625 = vmatpush.msra.mxu3 %v177_v46 }
 0xcc7   :  { %1844 = vmatmul.msk.f32.vlgmr.msrb.gmra.mxu3 %vm395_vm9, %v1391_v49  ;;  %v174_v49 = vld [vmem:[%s2699_s16 + $0x58] sm:$0xff] }
 0xcc8   :  { %1626 = vmatpush.msra.mxu3 %v176_v47 }
 0xcca   :  { %1627 = vmatpush.msra.mxu3 %v175_v48 }
 0xccc   :  { %1628 = vmatpush.msra.mxu3 %v174_v49 }
 0xcce   :  { %1629 = vmatpush.msra.mxu3 %v173_v50 }
 0xd42   :  { %v1412_v51 = vpop.f32.mrf.mxu2 }
 0xd43   :  { %1845 = vmatmul.msk.f32.vlgmr.msra.gmra.mxu0 %vm334_vm8, %v1412_v51  ;;  %v172_v51 = vld [vmem:[%s2699_s16 + $0x48] sm:$0xff] }
 0xd44   :  { %1630 = vmatpush.msra.mxu3 %v172_v51 }
 0xd4a   :  { %v1435_v52 = vpop.f32.mrf.mxu3 }
 0xd4b   :  { %1846 = vmatmul.msk.f32.gmra.mxu0 %vm334_vm8, %v1435_v52  ;;  %v171_v52 = vld [vmem:[%s2699_s16 + $0x40] sm:$0xff] }
 0xd4c   :  { %1631 = vmatpush.msra.mxu3 %v171_v52  ;;  %v2006_v52 = vmov 8.0  }
 0xdc0   :  { %v1461_v55 = vpop.f32.mrf.mxu0 }
 0xdc1   :  { %v1491_v56 = vadd.f32 %v1490_v54, %v1461_v55 }
 0xdc3   :  { %v1499_v57 = vadd.f32 %v1881_v53, %v1491_v56 }
 0xdc5   :  { %v1501_v58 = vadd.f32 %v1499_v57, %v2451_v32 }
 0xdc7   :  { %v1503_v60 = vsel %vm185_vm0, %v1501_v58, 0.0 }
 0xdc8   :  { %1504 = vadd.xlane.f32.xlu1 %v1503_v60  ;;  %v1464_v62 = vpop.f32.mrf.mxu0 }
 0xdc9   :  { %v1494_v63 = vadd.f32 %v1493_v61, %v1464_v62 }
 0xdcb   :  { %v1500_v1 = vadd.f32 %v1881_v53, %v1494_v63  ;;  %v1884_v53 = vld [vmem:[%s2698_s15 + $0x1] ss:$0 sm:$0xff] }
 0xdcd   :  { %v1502_v2 = vadd.f32 %v1500_v1, %v2460_v39  ;;  %v160_v39 = vld [vmem:[%s2697_s14 + $0x38] sm:$0xff] }
 0xdce   :  { %1578 = vmatpush.msrb.mxu2 %v160_v39  ;;  %v1885_v39 = vld [vmem:[%s2700_s17 + $0x1] ss:$0 sm:$0xff] }
 0xdcf   :  { %v1506_v3 = vsel %vm185_vm0, %v1502_v2, 0.0 }
 0xdd0   :  { %1507 = vadd.xlane.f32.xlu2 %v1506_v3  ;;  %1579 = vmatpush.msrb.mxu2 %v159_v14 }
 0xdd2   :  { %1580 = vmatpush.msrb.mxu2 %v158_v15 }
 0xdd4   :  { %1581 = vmatpush.msrb.mxu2 %v157_v16 }
 0xe3b   :  { %v1505_v4 = vpop.xlane.xlu1 %1504 }
 0xe3c   :  { %v1509_v5 = vmul.f32 %v1505_v4, %v2139_v10 }
 0xe3e   :  { %v1511_v6 = vsub.f32 %v1501_v58, %v1509_v5 }
 0xe40   :  { %v1513_v7 = vmul.f32 %v1511_v6, %v1511_v6 }
 0xe42   :  { %v1515_v8 = vsel %vm185_vm0, %v1513_v7, 0.0 }
 0xe43   :  { %v1508_v32 = vpop.xlane.xlu2 %1507  ;;  %1516 = vadd.xlane.f32.xlu0 %v1515_v8 }
 0xe44   :  { %v1510_v9 = vmul.f32 %v1508_v32, %v2139_v10 }
 0xe46   :  { %v1512_v11 = vsub.f32 %v1502_v2, %v1510_v9 }
 0xe48   :  { %v1514_v12 = vmul.f32 %v1512_v11, %v1512_v11 }
 0xe4a   :  { %v1518_v13 = vsel %vm185_vm0, %v1514_v12, 0.0 }
 0xe4b   :  { %1519 = vadd.xlane.f32.xlu1 %v1518_v13 }
 0xeb6   :  { %v1517_v17 = vpop.xlane.xlu0 %1516 }
 0xeb7   :  { %v1521_v18 = vmul.f32 %v1517_v17, %v2139_v10 }
 0xeb9   :  { %v1523_v19 = vadd.f32 1e-12, %v1521_v18 }
 0xebb   :  { %1939 = vrsqrt.f32 %v1523_v19  ;;  %vm1531_vm9 = vweird.f32 %v1523_v19 }
 0xebe   :  { %v1520_v20 = vpop.xlane.xlu1 %1519 }
 0xebf   :  { %v1522_v21 = vmul.f32 %v1520_v20, %v2139_v10 }
 0xec1   :  { %v1940_v25 = vpop.eup %1939  ;;  %v1524_v22 = vadd.f32 1e-12, %v1522_v21 }
 0xec2   :  { %v1526_v23 = vmul.f32 %v1940_v25, %v1523_v19  ;;  %vm1532_vm8 = vweird.f32 %v1940_v25 }
 0xec3   :  { %1941 = vrsqrt.f32 %v1524_v22  ;;  %vm1533_vm2 = vmor %vm1531_vm9, %vm1532_vm8  ;;  %vm1541_vm5 = vweird.f32 %v1524_v22 }
 0xec4   :  { %v1527_v31 = vmul.f32 %v1940_v25, %v1526_v23 }
 0xec6   :  { %v1528_v24 = vmul.f32 0.5, %v1527_v31 }
 0xec8   :  { %v1529_v26 = vsub.f32 1.5, %v1528_v24 }
 0xec9   :  { %v1942_v27 = vpop.eup %1941 }
 0xeca   :  { %v1530_v28 = vmul.f32 %v1940_v25, %v1529_v26  ;;  %v1536_v29 = vmul.f32 %v1942_v27, %v1524_v22  ;;  %vm1542_vm3 = vweird.f32 %v1942_v27 }
 0xecb   :  { %vm1543_vm6 = vmor %vm1541_vm5, %vm1542_vm3 }
 0xecc   :  { %v1534_v33 = vsel %vm1533_vm2, %v1940_v25, %v1530_v28  ;;  %v1537_v34 = vmul.f32 %v1942_v27, %v1536_v29 }
 0xecd   :  { %v1545_v35 = vmul.f32 %v1534_v33, %v1511_v6 }
 0xece   :  { %v1538_v36 = vmul.f32 0.5, %v1537_v34 }
 0xecf   :  { %v1550_v37 = vmul.f32 %v1882_v30, %v1545_v35 }
 0xed0   :  { %v1539_v38 = vsub.f32 1.5, %v1538_v36  ;;  %v1722_v36 = vld [vmem:[%s2703_s20 + $0x10] sm:$0xff] }
 0xed1   :  { %v1555_v0 = vadd.f32 %v1883_v59, %v1550_v37 }
 0xed2   :  { %v1540_v40 = vmul.f32 %v1942_v27, %v1539_v38  ;;  %v1721_v38 = vld [vmem:[%s2703_s20 + $0x8] sm:$0xff] }
 0xed3   :  { %1849 = vmatmul.msk.f32.vlgmr.msrb.gmra.mxu2 %vm185_vm0, %v1555_v0 }
 0xed4   :  { %v1544_v41 = vsel %vm1543_vm6, %v1942_v27, %v1540_v40  ;;  %v1720_v40 = vld [vmem:[%s2703_s20] sm:$0xff] }
 0xed5   :  { %v1546_v42 = vmul.f32 %v1544_v41, %v1512_v11 }
 0xed7   :  { %v1551_v43 = vmul.f32 %v1882_v30, %v1546_v42 }
 0xed9   :  { %v1556_v44 = vadd.f32 %v1883_v59, %v1551_v43  ;;  %v1723_v59 = vld [vmem:[%s2703_s20 + $0x18] sm:$0xff] }
 0xeda   :  { %1746 = vmatpush.msrb.mxu0 %v1723_v59 }
 0xedb   :  { %1850 = vmatmul.msk.f32.gmra.mxu2 %vm185_vm0, %v1556_v44 }
 0xedc   :  { %1747 = vmatpush.msrb.mxu0 %v1722_v36 }
 0xede   :  { %1748 = vmatpush.msrb.mxu0 %v1721_v38 }
 0xee0   :  { %1749 = vmatpush.msrb.mxu0 %v1720_v40 }
 0xf56   :  { %v1583_v54 = vpop.f32.mrf.mxu2 }
 0xf57   :  { %v1584_v55 = vadd.f32 %v1884_v53, %v1583_v54 }
 0xf59   :  { %v1589_v56 = vmul.f32 %v1584_v55, %v1584_v55 }
 0xf5b   :  { %v1591_v57 = vmul.f32 %v1589_v56, %v1584_v55 }
 0xf5d   :  { %v1593_v58 = vmul.f32 0.044715, %v1591_v57 }
 0xf5e   :  { %v1586_v60 = vpop.f32.mrf.mxu2 }
 0xf5f   :  { %v1595_v61 = vadd.f32 %v1593_v58, %v1584_v55  ;;  %v1587_v62 = vadd.f32 %v1884_v53, %v1586_v60  ;;  %v1887_v53 = vld [vmem:[%s2702_s19 + $0x1] ss:$0 sm:$0xff] }
 0xf61   :  { %v1597_v63 = vmul.f32 0.7978846, %v1595_v61  ;;  %v1590_v1 = vmul.f32 %v1587_v62, %v1587_v62 }
 0xf63   :  { %1943 = vtanh.f32 %v1597_v63  ;;  %v1592_v2 = vmul.f32 %v1590_v1, %v1587_v62 }
 0xf65   :  { %v1594_v3 = vmul.f32 0.044715, %v1592_v2 }
 0xf67   :  { %v1596_v4 = vadd.f32 %v1594_v3, %v1587_v62 }
 0xf69   :  { %v1944_v5 = vpop.eup %1943  ;;  %v1598_v6 = vmul.f32 0.7978846, %v1596_v4 }
 0xf6a   :  { %v1601_v7 = vadd.f32 1.0, %v1944_v5 }
 0xf6b   :  { %1945 = vtanh.f32 %v1598_v6 }
 0xf6c   :  { %v1603_v8 = vmul.f32 0.5, %v1601_v7 }
 0xf6e   :  { %v1605_v32 = vmul.f32 %v1603_v8, %v1584_v55 }
 0xf70   :  { %1851 = vmatmul.msk.f32.vlgmr.msra.gmra.mxu3 %vm890_vm4, %v1605_v32 }
 0xf71   :  { %v1946_v9 = vpop.eup %1945 }
 0xf72   :  { %v1602_v11 = vadd.f32 1.0, %v1946_v9 }
 0xf74   :  { %v1604_v12 = vmul.f32 0.5, %v1602_v11 }
 0xf76   :  { %v1606_v13 = vmul.f32 %v1604_v12, %v1587_v62 }
 0xf78   :  { %1852 = vmatmul.msk.f32.gmra.mxu3 %vm890_vm4, %v1606_v13 }
 0xff3   :  { %v1633_v14 = vpop.f32.mrf.mxu3 }
 0xff4   :  { %v1634_v15 = vadd.f32 %v1885_v39, %v1633_v14 }
 0xff6   :  { %v1639_v16 = vadd.f32 %v1634_v15, %v1555_v0 }
 0xff8   :  { %v1641_v17 = vsel %vm185_vm0, %v1639_v16, 0.0 }
 0xff9   :  { %1642 = vadd.xlane.f32.xlu2 %v1641_v17 }
 0xffb   :  { %v1636_v18 = vpop.f32.mrf.mxu3 }
 0xffc   :  { %v1637_v19 = vadd.f32 %v1885_v39, %v1636_v18 }
 0xffe   :  { %v1640_v20 = vadd.f32 %v1637_v19, %v1556_v44 }
0x1000   :  { %v1644_v21 = vsel %vm185_vm0, %v1640_v20, 0.0 }
0x1001   :  { %1645 = vadd.xlane.f32.xlu0 %v1644_v21 }
0x106c   :  { %v1643_v25 = vpop.xlane.xlu2 %1642 }
0x106d   :  { %v1647_v22 = vmul.f32 %v1643_v25, %v2139_v10 }
0x106f   :  { %v1649_v23 = vsub.f32 %v1639_v16, %v1647_v22 }
0x1071   :  { %v1651_v31 = vmul.f32 %v1649_v23, %v1649_v23 }
0x1073   :  { %v1653_v24 = vsel %vm185_vm0, %v1651_v31, 0.0 }
0x1074   :  { %1654 = vadd.xlane.f32.xlu1 %v1653_v24  ;;  %v1646_v26 = vpop.xlane.xlu0 %1645 }
0x1075   :  { %v1648_v27 = vmul.f32 %v1646_v26, %v2139_v10 }
0x1077   :  { %v1650_v28 = vsub.f32 %v1640_v20, %v1648_v27 }
0x1079   :  { %v1652_v29 = vmul.f32 %v1650_v28, %v1650_v28 }
0x107b   :  { %v1656_v30 = vsel %vm185_vm0, %v1652_v29, 0.0 }
0x107c   :  { %1657 = vadd.xlane.f32.xlu2 %v1656_v30 }
0x10e7   :  { %v1655_v33 = vpop.xlane.xlu1 %1654 }
0x10e8   :  { %v1659_v34 = vmul.f32 %v1655_v33, %v2139_v10 }
0x10ea   :  { %v1661_v35 = vadd.f32 1e-12, %v1659_v34 }
0x10ec   :  { %1947 = vrsqrt.f32 %v1661_v35  ;;  %vm1669_vm7 = vweird.f32 %v1661_v35 }
0x10ef   :  { %v1658_v37 = vpop.xlane.xlu2 %1657 }
0x10f0   :  { %v1660_v0 = vmul.f32 %v1658_v37, %v2139_v10  ;;  %v1886_v10 = vld [vmem:[%s2701_s18 + $0x1] ss:$0 sm:$0xff]  ;;  %s2007_s18 = smov [#allocation2]  }
0x10f1   :  { %s1759_s19 = sshll.u32 %s2007_s18, 4  ;;  %s1760_s19 = int_to_ptr.vmem [resolvable:$true] %s1759_s19 }
0x10f2   :  { %v1948_v41 = vpop.eup %1947  ;;  %v1662_v42 = vadd.f32 1e-12, %v1660_v0 }
0x10f3   :  { %v1664_v43 = vmul.f32 %v1948_v41, %v1661_v35  ;;  %vm1670_vm4 = vweird.f32 %v1948_v41 }
0x10f4   :  { %1949 = vrsqrt.f32 %v1662_v42  ;;  %vm1671_vm10 = vmor %vm1669_vm7, %vm1670_vm4  ;;  %vm1679_vm12 = vweird.f32 %v1662_v42 }
0x10f5   :  { %v1665_v44 = vmul.f32 %v1948_v41, %v1664_v43  ;;  %1951 = vrcp.f32 %v2006_v52 }
0x10f7   :  { %v1666_v45 = vmul.f32 0.5, %v1665_v44 }
0x10f9   :  { %v1667_v46 = vsub.f32 1.5, %v1666_v45 }
0x10fa   :  { %v1950_v47 = vpop.eup %1949 }
0x10fb   :  { %v1668_v48 = vmul.f32 %v1948_v41, %v1667_v46  ;;  %v1674_v49 = vmul.f32 %v1950_v47, %v1662_v42  ;;  %vm1680_vm11 = vweird.f32 %v1950_v47  ;;  %v1952_v60 = vpop.eup %1951 }
0x10fc   :  { %vm1681_vm13 = vmor %vm1679_vm12, %vm1680_vm11  ;;  %v1712_v3 = vmul.f32 8.0, %v1952_v60  ;;  %vm1716_vm14 = vweird.f32 %v1952_v60 }
0x10fd   :  { %v1672_v50 = vsel %vm1671_vm10, %v1948_v41, %v1668_v48  ;;  %v1675_v51 = vmul.f32 %v1950_v47, %v1674_v49 }
0x10fe   :  { %v1683_v54 = vmul.f32 %v1672_v50, %v1649_v23  ;;  %v1713_v8 = vsub.f32 1.0, %v1712_v3  ;;  %v1888_v23 = vld [vmem:[%s2704_s21] ss:$0 sm:$0xff] }
0x10ff   :  { %v1676_v55 = vmul.f32 0.5, %v1675_v51 }
0x1100   :  { %v1688_v56 = vmul.f32 %v1886_v10, %v1683_v54  ;;  %v1714_v12 = vmul.f32 %v1952_v60, %v1713_v8 }
0x1101   :  { %v1677_v57 = vsub.f32 1.5, %v1676_v55 }
0x1102   :  { %v1693_v58 = vadd.f32 %v1887_v53, %v1688_v56  ;;  %v1715_v15 = vadd.f32 %v1952_v60, %v1714_v12 }
0x1103   :  { %v1678_v61 = vmul.f32 %v1950_v47, %v1677_v57 }
0x1104   :  { %v1697_v62 = vsel %vm185_vm0, %v1693_v58, 0.0  ;;  %1695 = vst.msk [vmem:[#allocation2] sm:$0xff] %vm185_vm0, %v1693_v58  ;;  %v1717_v19 = vsel %vm1716_vm14, %v1952_v60, %v1715_v15 }
0x1105   :  { %v1698_v63 = vrot.slane %v1697_v62, 4  ;;  %v1682_v1 = vsel %vm1681_vm13, %v1950_v47, %v1678_v61 }
0x1106   :  { %v1684_v2 = vmul.f32 %v1682_v1, %v1650_v28 }
0x1107   :  { %v1699_v4 = vadd.f32 %v1698_v63, %v1697_v62 }
0x1108   :  { %v1689_v5 = vmul.f32 %v1886_v10, %v1684_v2 }
0x1109   :  { %v1700_v6 = vrot.slane %v1699_v4, 2 }
0x110a   :  { %v1694_v7 = vadd.f32 %v1887_v53, %v1689_v5 }
0x110b   :  { %v1701_v11 = vadd.f32 %v1700_v6, %v1699_v4 }
0x110c   :  { %v1704_v32 = vsel %vm185_vm0, %v1694_v7, 0.0  ;;  %1696 = vst.msk [vmem:[#allocation2 + $0x8] sm:$0xff] %vm185_vm0, %v1694_v7 }
0x110d   :  { %v1705_v9 = vrot.slane %v1704_v32, 4  ;;  %v1702_v39 = vrot.slane %v1701_v11, 1  ;;  %1767 = dma.vmem_to_hbm [thread:$0]  %s1760_s19, 256, %s1762_s29, [#allocation3], %s2008_s3, %s2008_s3, %s2009_s10  }
0x110f   :  { %v1706_v13 = vadd.f32 %v1705_v9, %v1704_v32  ;;  %v1703_v17 = vadd.f32 %v1702_v39, %v1701_v11 }
0x1111   :  { %v1707_v14 = vrot.slane %v1706_v13, 2  ;;  %v1718_v21 = vmul.f32 %v1717_v19, %v1703_v17 }
0x1113   :  { %v1708_v16 = vadd.f32 %v1707_v14, %v1706_v13 }
0x1115   :  { %v1709_v18 = vrot.slane %v1708_v16, 1 }
0x1117   :  { %v1710_v20 = vadd.f32 %v1709_v18, %v1708_v16 }
0x1119   :  { %v1719_v25 = vmul.f32 %v1717_v19, %v1710_v20 }
0x111b   :  { %v1731_v22 = vsel %vm1730_vm15, %v1719_v25, %v1718_v21 }
0x111c   :  { %1853 = vmatmul.msk.f32.vlgmr.msrb.gmra.mxu0 %vm185_vm0, %v1731_v22 }
0x1199   :  { %v1751_v31 = vpop.f32.mrf.mxu0 }
0x119a   :  { %v1752_v24 = vadd.f32 %v1888_v23, %v1751_v31 }
0x119c   :  { %1754 = vst [vmem:[#allocation4] sm:$0x3] %v1752_v24 }
0x119d   :  { %1778 = dma.vmem_to_hbm [thread:$0]  %s1774_s30, 32, %s1776_s24, [#allocation5]  }
0x119e   :  { %2001 = dma.done.wait [#allocation3], 256  }
0x119f   :  { %2002 = vsyncadd [#allocation3], 4294967040 }
0x11a0   :  { %2003 = dma.done.wait [#allocation5], 32  }
0x11a1   :  { %2004 = vsyncadd [#allocation5], 4294967264 }
0x11a2   :  { %1787 = vsyncpa [#allocation3], 1 }
0x11a3   :  { %1788 = vsyncpa [#allocation5], 1 }

</bundles_post_ra>
